<compile_context>
chip_gen: v6e
topology: v6e:2x2x1
jax: 0.10.0
libtpu: 0.0.40
codegen_flags: <defaults>
</compile_context>

<pallas_src>
import jax
import jax.numpy as jnp
from jax.experimental import pallas as pl
from jax.experimental.pallas import tpu as pltpu


H1 = 1024
H2 = 512
H3 = 180
H3_PAD = 256      # 180 padded up to a multiple of 128 (zero-padded)
HEAD_PAD = 128    # fused head lanes: col 0 = classifier_s, cols 1..nclasses = classifier_c


def _round_up(x, m):
    return ((x + m - 1) // m) * m


def _choose_tile_b(batch):
    """Pick the batch tile.

    * batch <= 128     : snug 16-aligned tile (bf16 sublane packing) -> no
                         16x redundant MXU/VPU rows for tiny batches.
    * 128 < batch <=512: split into 2 tiles so the grid's "parallel" axis can
                         shard across both v7x TensorCores.
    * large batch      : 256 rows fills the 256-row MXU on v6e/v7x and halves
                         per-grid-step overhead vs 128 (also fine on v5e).
    """
    if batch <= 128:
        return _round_up(batch, 16)
    if batch <= 512:
        return _round_up(-(-batch // 2), 16)
    return 256


def _netd_kernel(x_ref,
                 w1_ref, b1_ref,
                 w2_ref, b2_ref,
                 w3_ref, b3_ref,
                 wh_ref, bh_ref,
                 out_ref):
    # linear_1: Linear(dimension, 1024) + ReLU.
    # bf16 MXU feed, f32 accumulation, f32 bias+ReLU (v5e has no bf16 VPU),
    # then an immediate bf16 cast so only the half-size copy stays live.
    h1 = jnp.dot(x_ref[...], w1_ref[...], preferred_element_type=jnp.float32)
    h1 = jnp.maximum(h1 + b1_ref[...], 0.0).astype(jnp.bfloat16)

    # linear_2: Linear(1024, 512) + ReLU
    h2 = jnp.dot(h1, w2_ref[...], preferred_element_type=jnp.float32)
    h2 = jnp.maximum(h2 + b2_ref[...], 0.0).astype(jnp.bfloat16)

    # linear_3: Linear(512, 180 -> 256 padded) + ReLU (+ Dropout == identity, eval)
    h3 = jnp.dot(h2, w3_ref[...], preferred_element_type=jnp.float32)
    h3 = jnp.maximum(h3 + b3_ref[...], 0.0).astype(jnp.bfloat16)

    # fused heads: one (256 x 128) matmul producing raw logits only
    # (lane-dense unmasked store). Sigmoid for column 0 happens in the
    # wrapper on the (B, 1) slice, keeping EUP/select work out of the kernel.
    out_ref[...] = jnp.dot(h3, wh_ref[...],
                           preferred_element_type=jnp.float32) + bh_ref[...]


def prepare_params(params, nclasses):
    """Cast to bf16, pad D and the 180-wide layer, fuse + pad the two heads."""
    head = 1 + nclasses
    assert head <= HEAD_PAD, (
        f"fused head needs 1 + nclasses <= {HEAD_PAD}, got {head}")

    D = params["w1"].shape[0]
    D_pad = _round_up(D, 128)
    w1p = jnp.zeros((D_pad, H1), jnp.bfloat16)
    w1p = w1p.at[:D, :].set(params["w1"].astype(jnp.bfloat16))

    w3p = jnp.zeros((H2, H3_PAD), jnp.bfloat16)
    w3p = w3p.at[:, :H3].set(params["w3"].astype(jnp.bfloat16))
    b3p = jnp.zeros((1, H3_PAD), jnp.float32).at[:, :H3].set(params["b3"])

    wh = jnp.zeros((H3_PAD, HEAD_PAD), jnp.bfloat16)
    wh = wh.at[:H3, 0:1].set(params["ws"].astype(jnp.bfloat16))
    wh = wh.at[:H3, 1:head].set(params["wc"].astype(jnp.bfloat16))
    bh = jnp.zeros((1, HEAD_PAD), jnp.float32)
    bh = bh.at[:, 0:1].set(params["bs"])
    bh = bh.at[:, 1:head].set(params["bc"])

    return dict(
        w1=w1p, b1=params["b1"].astype(jnp.float32),
        w2=params["w2"].astype(jnp.bfloat16), b2=params["b2"].astype(jnp.float32),
        w3=w3p, b3=b3p, wh=wh, bh=bh,
    )


def netd_forward(x, packed, nclasses, tile_b=None):
    """x: (B, dimension) float32; packed: output of prepare_params."""
    B, D = x.shape
    D_pad = packed["w1"].shape[0]
    assert D <= D_pad
    assert 1 + nclasses <= HEAD_PAD

    if tile_b is None:
        tile_b = _choose_tile_b(B)
    grid_b = pl.cdiv(B, tile_b)
    b_pad = grid_b * tile_b
    # zero-pad batch to the tile and D to a multiple of 128 (lane-dense x,
    # K-aligned first matmul); pad rows/cols contribute exact zeros.
    x_pad = jnp.pad(x, ((0, b_pad - B), (0, D_pad - D))).astype(jnp.bfloat16)

    args = (x_pad,
            packed["w1"], packed["b1"],
            packed["w2"], packed["b2"],
            packed["w3"], packed["b3"],
            packed["wh"], packed["bh"])

    const = lambda i: (0, 0)   # weights / biases stay VMEM-resident across the grid
    in_specs = [
        pl.BlockSpec((tile_b, D_pad), lambda i: (i, 0)),
        pl.BlockSpec((D_pad, H1), const), pl.BlockSpec((1, H1), const),
        pl.BlockSpec((H1, H2), const), pl.BlockSpec((1, H2), const),
        pl.BlockSpec((H2, H3_PAD), const), pl.BlockSpec((1, H3_PAD), const),
        pl.BlockSpec((H3_PAD, HEAD_PAD), const), pl.BlockSpec((1, HEAD_PAD), const),
    ]
    out_spec = pl.BlockSpec((tile_b, HEAD_PAD), lambda i: (i, 0))

    flops = 2 * b_pad * (D_pad * H1 + H1 * H2 + H2 * H3_PAD + H3_PAD * HEAD_PAD)
    bytes_accessed = sum(int(a.size) * a.dtype.itemsize for a in args)
    bytes_accessed += b_pad * HEAD_PAD * 4          # output writeback
    cost = pl.CostEstimate(flops=flops, transcendentals=0,
                           bytes_accessed=bytes_accessed)

    out = pl.pallas_call(
        _netd_kernel,
        out_shape=jax.ShapeDtypeStruct((b_pad, HEAD_PAD), jnp.float32),
        grid_spec=pltpu.PrefetchScalarGridSpec(
            num_scalar_prefetch=0,
            grid=(grid_b,),
            in_specs=in_specs,
            out_specs=out_spec,
        ),
        compiler_params=pltpu.CompilerParams(
            dimension_semantics=("parallel",),
            vmem_limit_bytes=32 * 1024 * 1024,
        ),
        cost_estimate=cost,
    )(*args)

    out_s = jax.nn.sigmoid(out[:B, 0:1])        # classifier_s: Linear + Sigmoid
    out_c = out[:B, 1:1 + nclasses]             # classifier_c: Linear
    return out_s, out_c


def init_params(key, dimension, nclasses):
    """Deterministic synthetic parameters matching _netD layer shapes.

    Weights are stored transposed relative to PyTorch ((in, out) instead of
    (out, in)); biases are 2-D (1, out) for clean broadcasting.
    """
    sizes = [("w1", (dimension, H1)), ("b1", (1, H1)),
             ("w2", (H1, H2)),        ("b2", (1, H2)),
             ("w3", (H2, H3)),        ("b3", (1, H3)),
             ("ws", (H3, 1)),         ("bs", (1, 1)),
             ("wc", (H3, nclasses)),  ("bc", (1, nclasses))]
    params = {}
    for name, shape in sizes:
        key, sub = jax.random.split(key)
        fan_in = shape[0] if name.startswith("w") else shape[1]
        scale = 1.0 / jnp.sqrt(jnp.float32(fan_in))
        params[name] = scale * jax.random.normal(sub, shape, jnp.float32)
    return params


def _reference_forward(x, p):
    """Pure-JAX reference mirroring the kernel's bf16-in / f32-accumulate scheme."""
    bf = lambda a: a.astype(jnp.bfloat16)
    h = jnp.maximum(jnp.dot(bf(x), bf(p["w1"]),
                            preferred_element_type=jnp.float32) + p["b1"], 0.0)
    h = jnp.maximum(jnp.dot(bf(h), bf(p["w2"]),
                            preferred_element_type=jnp.float32) + p["b2"], 0.0)
    h = jnp.maximum(jnp.dot(bf(h), bf(p["w3"]),
                            preferred_element_type=jnp.float32) + p["b3"], 0.0)
    out_s = jax.nn.sigmoid(jnp.dot(bf(h), bf(p["ws"]),
                                   preferred_element_type=jnp.float32) + p["bs"])
    out_c = jnp.dot(bf(h), bf(p["wc"]),
                    preferred_element_type=jnp.float32) + p["bc"]
    return out_s, out_c


if __name__ == "__main__":
    dimension = 32   # input feature dim
    nclasses = 4

    key = jax.random.PRNGKey(0)
    key, pkey = jax.random.split(key)
    params = init_params(pkey, dimension, nclasses)
    packed = prepare_params(params, nclasses)

    # check both the tiny-batch (single snug tile) and two-tile paths
    for batch in (8, 200):
        key, xkey = jax.random.split(key)
        x = jax.random.normal(xkey, (batch, dimension), jnp.float32)

        out_s, out_c = netd_forward(x, packed, nclasses)
        jax.block_until_ready((out_s, out_c))

        ref_s, ref_c = _reference_forward(x, params)
        assert out_s.shape == (batch, 1)
        assert out_c.shape == (batch, nclasses)
        assert jnp.allclose(out_s, ref_s, atol=2e-3, rtol=2e-3)
        assert jnp.allclose(out_c, ref_c, atol=5e-3, rtol=5e-3)

    print("KERNEL_OK")
</pallas_src>

<mosaic_0001>
module attributes {stable_mosaic.version = 11 : i64} {
  func.func @_netd_kernel(%arg0: i32, %arg1: memref<16x128xbf16, #tpu.memory_space<vmem>>, %arg2: memref<128x1024xbf16, #tpu.memory_space<vmem>>, %arg3: memref<1x1024xf32, #tpu.memory_space<vmem>>, %arg4: memref<1024x512xbf16, #tpu.memory_space<vmem>>, %arg5: memref<1x512xf32, #tpu.memory_space<vmem>>, %arg6: memref<512x256xbf16, #tpu.memory_space<vmem>>, %arg7: memref<1x256xf32, #tpu.memory_space<vmem>>, %arg8: memref<256x128xbf16, #tpu.memory_space<vmem>>, %arg9: memref<1x128xf32, #tpu.memory_space<vmem>>, %arg10: memref<16x128xf32, #tpu.memory_space<vmem>>) attributes {dimension_semantics = [#tpu.dimension_semantics<parallel>], iteration_bounds = array<i64: 1>, scalar_prefetch = 0 : i64, scratch_operands = 0 : i64, tpu.core_type = #tpu.core_type<tc>, window_params = [{transform_indices = @transform_0, window_bounds = array<i64: 16, 128>}, {pipeline_mode = #tpu.pipeline_mode<synchronous>, transform_indices = @transform_1, window_bounds = array<i64: 128, 1024>}, {pipeline_mode = #tpu.pipeline_mode<synchronous>, transform_indices = @transform_2, window_bounds = array<i64: 1, 1024>}, {pipeline_mode = #tpu.pipeline_mode<synchronous>, transform_indices = @transform_3, window_bounds = array<i64: 1024, 512>}, {pipeline_mode = #tpu.pipeline_mode<synchronous>, transform_indices = @transform_4, window_bounds = array<i64: 1, 512>}, {pipeline_mode = #tpu.pipeline_mode<synchronous>, transform_indices = @transform_5, window_bounds = array<i64: 512, 256>}, {pipeline_mode = #tpu.pipeline_mode<synchronous>, transform_indices = @transform_6, window_bounds = array<i64: 1, 256>}, {pipeline_mode = #tpu.pipeline_mode<synchronous>, transform_indices = @transform_7, window_bounds = array<i64: 256, 128>}, {pipeline_mode = #tpu.pipeline_mode<synchronous>, transform_indices = @transform_8, window_bounds = array<i64: 1, 128>}, {transform_indices = @transform_9, window_bounds = array<i64: 16, 128>}]} {
    %c0 = arith.constant 0 : index
    %c0_0 = arith.constant 0 : index
    %0 = vector.load %arg1[%c0, %c0_0] : memref<16x128xbf16, #tpu.memory_space<vmem>>, vector<16x128xbf16>
    %c0_1 = arith.constant 0 : index
    %c0_2 = arith.constant 0 : index
    %1 = vector.load %arg2[%c0_1, %c0_2] : memref<128x1024xbf16, #tpu.memory_space<vmem>>, vector<128x1024xbf16>
    %cst = arith.constant dense<0.000000e+00> : vector<16x1024xf32>
    %2 = tpu.matmul %0, %1, %cst {dimension_numbers = #tpu.dot_dimension_numbers<[1], [0], [0], [1], [0, 0, 1, 1], [], []>} : vector<16x128xbf16>, vector<128x1024xbf16>, vector<16x1024xf32> -> vector<16x1024xf32>
    %c0_3 = arith.constant 0 : index
    %c0_4 = arith.constant 0 : index
    %3 = vector.load %arg3[%c0_3, %c0_4] : memref<1x1024xf32, #tpu.memory_space<vmem>>, vector<1x1024xf32>
    %4 = vector.broadcast %3 : vector<1x1024xf32> to vector<16x1024xf32>
    %5 = arith.addf %2, %4 : vector<16x1024xf32>
    %cst_5 = arith.constant 0.000000e+00 : f32
    %6 = vector.broadcast %cst_5 : f32 to vector<16x1024xf32>
    %7 = arith.maximumf %5, %6 : vector<16x1024xf32>
    %8 = arith.truncf %7 : vector<16x1024xf32> to vector<16x1024xbf16>
    %c0_6 = arith.constant 0 : index
    %c0_7 = arith.constant 0 : index
    %9 = vector.load %arg4[%c0_6, %c0_7] : memref<1024x512xbf16, #tpu.memory_space<vmem>>, vector<1024x512xbf16>
    %cst_8 = arith.constant dense<0.000000e+00> : vector<16x512xf32>
    %10 = tpu.matmul %8, %9, %cst_8 {dimension_numbers = #tpu.dot_dimension_numbers<[1], [0], [0], [1], [0, 0, 1, 1], [], []>} : vector<16x1024xbf16>, vector<1024x512xbf16>, vector<16x512xf32> -> vector<16x512xf32>
    %c0_9 = arith.constant 0 : index
    %c0_10 = arith.constant 0 : index
    %11 = vector.load %arg5[%c0_9, %c0_10] : memref<1x512xf32, #tpu.memory_space<vmem>>, vector<1x512xf32>
    %12 = vector.broadcast %11 : vector<1x512xf32> to vector<16x512xf32>
    %13 = arith.addf %10, %12 : vector<16x512xf32>
    %cst_11 = arith.constant 0.000000e+00 : f32
    %14 = vector.broadcast %cst_11 : f32 to vector<16x512xf32>
    %15 = arith.maximumf %13, %14 : vector<16x512xf32>
    %16 = arith.truncf %15 : vector<16x512xf32> to vector<16x512xbf16>
    %c0_12 = arith.constant 0 : index
    %c0_13 = arith.constant 0 : index
    %17 = vector.load %arg6[%c0_12, %c0_13] : memref<512x256xbf16, #tpu.memory_space<vmem>>, vector<512x256xbf16>
    %cst_14 = arith.constant dense<0.000000e+00> : vector<16x256xf32>
    %18 = tpu.matmul %16, %17, %cst_14 {dimension_numbers = #tpu.dot_dimension_numbers<[1], [0], [0], [1], [0, 0, 1, 1], [], []>} : vector<16x512xbf16>, vector<512x256xbf16>, vector<16x256xf32> -> vector<16x256xf32>
    %c0_15 = arith.constant 0 : index
    %c0_16 = arith.constant 0 : index
    %19 = vector.load %arg7[%c0_15, %c0_16] : memref<1x256xf32, #tpu.memory_space<vmem>>, vector<1x256xf32>
    %20 = vector.broadcast %19 : vector<1x256xf32> to vector<16x256xf32>
    %21 = arith.addf %18, %20 : vector<16x256xf32>
    %cst_17 = arith.constant 0.000000e+00 : f32
    %22 = vector.broadcast %cst_17 : f32 to vector<16x256xf32>
    %23 = arith.maximumf %21, %22 : vector<16x256xf32>
    %24 = arith.truncf %23 : vector<16x256xf32> to vector<16x256xbf16>
    %c0_18 = arith.constant 0 : index
    %c0_19 = arith.constant 0 : index
    %25 = vector.load %arg8[%c0_18, %c0_19] : memref<256x128xbf16, #tpu.memory_space<vmem>>, vector<256x128xbf16>
    %cst_20 = arith.constant dense<0.000000e+00> : vector<16x128xf32>
    %26 = tpu.matmul %24, %25, %cst_20 {dimension_numbers = #tpu.dot_dimension_numbers<[1], [0], [0], [1], [0, 0, 1, 1], [], []>} : vector<16x256xbf16>, vector<256x128xbf16>, vector<16x128xf32> -> vector<16x128xf32>
    %c0_21 = arith.constant 0 : index
    %c0_22 = arith.constant 0 : index
    %27 = vector.load %arg9[%c0_21, %c0_22] : memref<1x128xf32, #tpu.memory_space<vmem>>, vector<1x128xf32>
    %28 = vector.broadcast %27 : vector<1x128xf32> to vector<16x128xf32>
    %29 = arith.addf %26, %28 : vector<16x128xf32>
    %c0_23 = arith.constant 0 : index
    %c0_24 = arith.constant 0 : index
    %30 = vector.load %arg10[%c0_23, %c0_24] : memref<16x128xf32, #tpu.memory_space<vmem>>, vector<16x128xf32>
    tpu.vector_store %arg10[%c0_23, %c0_24], %29 {strides = array<i32>} : memref<16x128xf32, #tpu.memory_space<vmem>>, vector<16x128xf32>,
    return
  }
  func.func @transform_0(%arg0: i32) -> (i32, i32) {
    %c0_i32 = arith.constant 0 : i32
    %c0_i32_0 = arith.constant 0 : i32
    return %arg0, %c0_i32 : i32, i32
  }
  func.func @transform_1(%arg0: i32) -> (i32, i32) {
    %c0_i32 = arith.constant 0 : i32
    %c0_i32_0 = arith.constant 0 : i32
    %c0_i32_1 = arith.constant 0 : i32
    return %c0_i32, %c0_i32_0 : i32, i32
  }
  func.func @transform_2(%arg0: i32) -> (i32, i32) {
    %c0_i32 = arith.constant 0 : i32
    %c0_i32_0 = arith.constant 0 : i32
    %c0_i32_1 = arith.constant 0 : i32
    return %c0_i32, %c0_i32_0 : i32, i32
  }
  func.func @transform_3(%arg0: i32) -> (i32, i32) {
    %c0_i32 = arith.constant 0 : i32
    %c0_i32_0 = arith.constant 0 : i32
    %c0_i32_1 = arith.constant 0 : i32
    return %c0_i32, %c0_i32_0 : i32, i32
  }
  func.func @transform_4(%arg0: i32) -> (i32, i32) {
    %c0_i32 = arith.constant 0 : i32
    %c0_i32_0 = arith.constant 0 : i32
    %c0_i32_1 = arith.constant 0 : i32
    return %c0_i32, %c0_i32_0 : i32, i32
  }
  func.func @transform_5(%arg0: i32) -> (i32, i32) {
    %c0_i32 = arith.constant 0 : i32
    %c0_i32_0 = arith.constant 0 : i32
    %c0_i32_1 = arith.constant 0 : i32
    return %c0_i32, %c0_i32_0 : i32, i32
  }
  func.func @transform_6(%arg0: i32) -> (i32, i32) {
    %c0_i32 = arith.constant 0 : i32
    %c0_i32_0 = arith.constant 0 : i32
    %c0_i32_1 = arith.constant 0 : i32
    return %c0_i32, %c0_i32_0 : i32, i32
  }
  func.func @transform_7(%arg0: i32) -> (i32, i32) {
    %c0_i32 = arith.constant 0 : i32
    %c0_i32_0 = arith.constant 0 : i32
    %c0_i32_1 = arith.constant 0 : i32
    return %c0_i32, %c0_i32_0 : i32, i32
  }
  func.func @transform_8(%arg0: i32) -> (i32, i32) {
    %c0_i32 = arith.constant 0 : i32
    %c0_i32_0 = arith.constant 0 : i32
    %c0_i32_1 = arith.constant 0 : i32
    return %c0_i32, %c0_i32_0 : i32, i32
  }
  func.func @transform_9(%arg0: i32) -> (i32, i32) {
    %c0_i32 = arith.constant 0 : i32
    %c0_i32_0 = arith.constant 0 : i32
    return %arg0, %c0_i32 : i32, i32
  }
}

</mosaic_0001>

<bundles_post_ra>
// kernel: tpu_custom_call.1
= control target key start
LH: loop header
LB: loop body
LE: loop exit
PB: predicated region body
PF: predicated region fallthrough
CT: control target
= control target key end

     0   :  { %14 = vsyncpa [#allocation3], 0  ;;  %s4637_s0 = inlined_call_operand.hbm [shape: bf16[16,128], index: 0, kind: input, shape index: {}]   ;;  %s4638_s1 = inlined_call_operand.hbm [shape: bf16[128,1024], index: 1, kind: input, shape index: {}]   ;;  %s4639_s2 = inlined_call_operand.hbm [shape: f32[1,1024], index: 2, kind: input, shape index: {}]   ;;  %s4640_s3 = inlined_call_operand.hbm [shape: bf16[1024,512], index: 3, kind: input, shape index: {}]   ;;  %s4641_s4 = inlined_call_operand.vmem [shape: f32[1,512], index: 4, kind: input, shape index: {}]   ;;  %s4642_s5 = inlined_call_operand.hbm [shape: bf16[512,256], index: 5, kind: input, shape index: {}]   ;;  %s4643_s6 = inlined_call_operand.vmem [shape: f32[1,256], index: 6, kind: input, shape index: {}]   ;;  %s4644_s7 = inlined_call_operand.hbm [shape: bf16[256,128], index: 7, kind: input, shape index: {}]   ;;  %s4645_s8 = inlined_call_operand.vmem [shape: f32[1,128], index: 8, kind: input, shape index: {}]   ;;  %s4646_s9 = inlined_call_operand.hbm [shape: f32[16,128], index: 9, kind: output, shape index: {}]  }
   0x1   :  { %15 = vsyncpa [#allocation6], 0 }
   0x2   :  { %16 = vsyncpa [#allocation9], 0 }
   0x3   :  { %17 = vsyncpa [#allocation12], 0 }
   0x4   :  { %18 = vsyncpa [#allocation4], 0  ;;  %s4431_s30 = smov [#allocation5]  }
   0x5   :  { %s36_s10 = sshll.u32 %s4431_s30, 4  ;;  %s37_s10 = int_to_ptr.vmem [resolvable:$true] %s36_s10 }
   0x6   :  { %s4289_s11 = scalar_lea.vmem %s37_s10, 8192  ;;  %p4294_p1 = scmp.lt.s32.totalorder %s37_s10, %s37_s10 }
   0x7   :  { %p4290_p0 = scmp.ne.s32.totalorder %s37_s10, %s4289_s11  ;;  %p4295_p2 = scmp.lt.s32.totalorder %s4289_s11, %s4289_s11 }
   0x9   :  { %p4296_p3 = por %p4295_p2, %p4294_p1 }
   0xb   :  { %p4297_p4 = pnand %p4296_p3, %p4290_p0 }
   0xd   :  { %4300 = shalt.err (!%p4297_p4)
}
   0xe   :  { %s4432_s12 = smov 512   ;;  %s4433_s13 = smov 32  }
   0xf   :  { %42 = dma.hbm_to_vmem [thread:$0]  %s4638_s1, 8192, %s37_s10, [#allocation6], %s4432_s12, %s4432_s12, %s4433_s13  }
  0x10   :  { %s4434_s16 = smov [#allocation8]  }
  0x11   :  { %s58_s17 = sshll.u32 %s4434_s16, 4  ;;  %s59_s17 = int_to_ptr.vmem [resolvable:$true] %s58_s17 }
  0x12   :  { %s4309_s18 = scalar_lea.vmem %s59_s17, 32768  ;;  %p4314_p6 = scmp.lt.s32.totalorder %s59_s17, %s59_s17 }
  0x13   :  { %p4310_p5 = scmp.ne.s32.totalorder %s59_s17, %s4309_s18  ;;  %p4315_p7 = scmp.lt.s32.totalorder %s4309_s18, %s4309_s18 }
  0x15   :  { %p4316_p8 = por %p4315_p7, %p4314_p6 }
  0x17   :  { %p4317_p9 = pnand %p4316_p8, %p4310_p5 }
  0x19   :  { %4320 = shalt.err (!%p4317_p9)
}
  0x1a   :  { %s4435_s19 = smov 256   ;;  %s4436_s20 = smov 16  }
  0x1b   :  { %64 = dma.hbm_to_vmem [thread:$0]  %s4640_s3, 32768, %s59_s17, [#allocation9], %s4435_s19, %s4435_s19, %s4436_s20  }
  0x1c   :  { %s4437_s23 = smov [#allocation2]  }
  0x1d   :  { %s24_s24 = sshll.u32 %s4437_s23, 4  ;;  %s25_s24 = int_to_ptr.vmem [resolvable:$true] %s24_s24 }
  0x1e   :  { %s4329_s1 = scalar_lea.vmem %s25_s24, 128  ;;  %p4334_p11 = scmp.lt.s32.totalorder %s25_s24, %s25_s24 }
  0x1f   :  { %p4330_p10 = scmp.ne.s32.totalorder %s25_s24, %s4329_s1  ;;  %p4335_p12 = scmp.lt.s32.totalorder %s4329_s1, %s4329_s1 }
  0x21   :  { %p4336_p13 = por %p4335_p12, %p4334_p11 }
  0x23   :  { %p4337_p0 = pnand %p4336_p13, %p4330_p10 }
  0x25   :  { %4340 = shalt.err (!%p4337_p0)
}
  0x26   :  { %s4438_s25 = smov 64   ;;  %s4439_s26 = smov 4  }
  0x27   :  { %30 = dma.hbm_to_vmem [thread:$0]  %s4637_s0, 128, %s25_s24, [#allocation3], %s4438_s25, %s4438_s25, %s4439_s26  }
  0x28   :  { %s4440_s3 = smov [#allocation7]   ;;  %s4441_s30 = smov [#allocation10]  }
  0x29   :  { %s49_s29 = sshll.u32 %s4440_s3, 4  ;;  %s72_s10 = sshll.u32 %s4441_s30, 4  ;;  %s50_s29 = int_to_ptr.vmem [resolvable:$true] %s49_s29  ;;  %s73_s10 = int_to_ptr.vmem [resolvable:$true] %s72_s10 }
  0x2a   :  { %s4349_s11 = scalar_lea.vmem %s50_s29, 128  ;;  %p4354_p2 = scmp.lt.s32.totalorder %s50_s29, %s50_s29 }
  0x2b   :  { %p4350_p1 = scmp.ne.s32.totalorder %s50_s29, %s4349_s11  ;;  %p4355_p3 = scmp.lt.s32.totalorder %s4349_s11, %s4349_s11 }
  0x2d   :  { %p4356_p4 = por %p4355_p3, %p4354_p2 }
  0x2f   :  { %p4357_p5 = pnand %p4356_p4, %p4350_p1 }
  0x31   :  { %4360 = shalt.err (!%p4357_p5)
}
  0x32   :  { %52 = dma.hbm_to_vmem [thread:$0]  %s4639_s2, 128, %s50_s29, [#allocation6]  }
  0x33   :  { %s4369_s14 = scalar_lea.vmem %s73_s10, 8192  ;;  %p4374_p7 = scmp.lt.s32.totalorder %s73_s10, %s73_s10 }
  0x34   :  { %p4370_p6 = scmp.ne.s32.totalorder %s73_s10, %s4369_s14  ;;  %p4375_p8 = scmp.lt.s32.totalorder %s4369_s14, %s4369_s14 }
  0x36   :  { %p4376_p9 = por %p4375_p8, %p4374_p7 }
  0x38   :  { %p4377_p10 = pnand %p4376_p9, %p4370_p6 }
  0x3a   :  { %4380 = shalt.err (!%p4377_p10)
}
  0x3b   :  { %s4442_s0 = smov 128   ;;  %s4443_s15 = smov 8  }
  0x3c   :  { %78 = dma.hbm_to_vmem [thread:$0]  %s4642_s5, 8192, %s73_s10, [#allocation9], %s4442_s0, %s4442_s0, %s4443_s15  }
  0x3d   :  { %s4444_s18 = smov [#allocation11]  }
  0x3e   :  { %s86_s19 = sshll.u32 %s4444_s18, 4  ;;  %s87_s19 = int_to_ptr.vmem [resolvable:$true] %s86_s19 }
  0x3f   :  { %s4389_s2 = scalar_lea.vmem %s87_s19, 2048  ;;  %p4394_p12 = scmp.lt.s32.totalorder %s87_s19, %s87_s19 }
  0x40   :  { %p4390_p11 = scmp.ne.s32.totalorder %s87_s19, %s4389_s2  ;;  %p4395_p13 = scmp.lt.s32.totalorder %s4389_s2, %s4389_s2 }
  0x42   :  { %p4396_p0 = por %p4395_p13, %p4394_p12 }
  0x44   :  { %p4397_p1 = pnand %p4396_p0, %p4390_p11 }
  0x46   :  { %4400 = shalt.err (!%p4397_p1)
}
  0x47   :  { %92 = dma.hbm_to_vmem [thread:$0]  %s4644_s7, 2048, %s87_s19, [#allocation12], %s4438_s25, %s4438_s25, %s4439_s26  }
  0x48   :  { %4421 = dma.done.wait [#allocation3], 128  }
  0x49   :  { %4422 = vsyncadd [#allocation3], 4294967168 }
  0x4a   :  { %4423 = dma.done.wait [#allocation6], 8320  }
  0x4b   :  { %4424 = vsyncadd [#allocation6], 4294958976 }
  0x4c   :  { %4425 = dma.done.wait [#allocation9], 40960  }
  0x4d   :  { %4426 = vsyncadd [#allocation9], 4294926336 }
  0x4e   :  { %4427 = dma.done.wait [#allocation12], 2048  }
  0x4f   :  { %4428 = vsyncadd [#allocation12], 4294965248  ;;  %v4445_v0 = vmov 0   ;;  %v172_v1 = vld [vmem:[#allocation5 + $0x1c0] sm:$0xff]  ;;  %v173_v3 = vld [vmem:[#allocation5 + $0x1c8] sm:$0xff]  ;;  %s4446_s24 = smov [#allocation13]  }
  0x50   :  { %580 = vmatprep.mubr.bf16.mxu0 %v4445_v0  ;;  %623 = vmatprep.mubr.bf16.mxu1 %v4445_v0  ;;  %v176_v2 = vld [vmem:[#allocation5 + $0x1e0] sm:$0xff]  ;;  %v177_v5 = vld [vmem:[#allocation5 + $0x1e8] sm:$0xff]  ;;  %v174_v62 = vld [vmem:[#allocation5 + $0x1d0] sm:$0xff]  ;;  %s3329_s1 = sshll.u32 %s4446_s24, 4  ;;  %s3330_s1 = int_to_ptr.vmem [resolvable:$true] %s3329_s1 }
  0x51   :  { %v3402_v4 = vcombine.high %v172_v1, %v176_v2  ;;  %v3401_v6 = vcombine.low %v172_v1, %v176_v2  ;;  %v164_v7 = vld [vmem:[#allocation5 + $0x180] sm:$0xff]  ;;  %v3404_v9 = vcombine.high %v173_v3, %v177_v5  ;;  %v3403_v10 = vcombine.low %v173_v3, %v177_v5  ;;  %v165_v12 = vld [vmem:[#allocation5 + $0x188] sm:$0xff]  ;;  %v178_v1 = vld [vmem:[#allocation5 + $0x1f0] sm:$0xff]  ;;  %s4401_s25 = scalar_lea.vmem %s3330_s1, 256  ;;  %p4406_p3 = scmp.lt.s32.totalorder %s3330_s1, %s3330_s1 }
  0x52   :  { %v168_v8 = vld [vmem:[#allocation5 + $0x1a0] sm:$0xff]  ;;  %v169_v13 = vld [vmem:[#allocation5 + $0x1a8] sm:$0xff]  ;;  %v175_v2 = vld [vmem:[#allocation5 + $0x1d8] sm:$0xff]  ;;  %p4402_p2 = scmp.ne.s32.totalorder %s3330_s1, %s4401_s25  ;;  %p4407_p4 = scmp.lt.s32.totalorder %s4401_s25, %s4401_s25 }
  0x53   :  { %v3394_v11 = vcombine.high %v164_v7, %v168_v8  ;;  %v156_v14 = vld [vmem:[#allocation5 + $0x140] sm:$0xff]  ;;  %548 = vmatprep.subr.bf16.mxu0 %v3402_v4  ;;  %v3396_v15 = vcombine.high %v165_v12, %v169_v13  ;;  %v157_v17 = vld [vmem:[#allocation5 + $0x148] sm:$0xff]  ;;  %591 = vmatprep.subr.bf16.mxu1 %v3404_v9  ;;  %v3393_v19 = vcombine.low %v164_v7, %v168_v8  ;;  %v179_v3 = vld [vmem:[#allocation5 + $0x1f8] sm:$0xff] }
  0x54   :  { %v160_v16 = vld [vmem:[#allocation5 + $0x160] sm:$0xff]  ;;  %v161_v18 = vld [vmem:[#allocation5 + $0x168] sm:$0xff]  ;;  %549 = vmatpush1.bf16.msra.mxu0 %v3401_v6  ;;  %592 = vmatpush1.bf16.msra.mxu1 %v3403_v10  ;;  %v3395_v20 = vcombine.low %v165_v12, %v169_v13  ;;  %v4526_v6 = vld [vmem:[#allocation2] sm:$0xff]   ;;  %v3406_v7 = vcombine.high %v174_v62, %v178_v1  ;;  %v3408_v9 = vcombine.high %v175_v2, %v179_v3  ;;  %p4408_p5 = por %p4407_p4, %p4406_p3 }
  0x55   :  { %550 = vmatprep.subr.bf16.mxu0 %v3394_v11  ;;  %v3386_v21 = vcombine.high %v156_v14, %v160_v16  ;;  %593 = vmatprep.subr.bf16.mxu1 %v3396_v15  ;;  %v3388_v22 = vcombine.high %v157_v17, %v161_v18  ;;  %v148_v23 = vld [vmem:[#allocation5 + $0x100] sm:$0xff]  ;;  %v149_v25 = vld [vmem:[#allocation5 + $0x108] sm:$0xff]  ;;  %v3385_v27 = vcombine.low %v156_v14, %v160_v16  ;;  %v166_v8 = vld [vmem:[#allocation5 + $0x190] sm:$0xff] }
  0x56   :  { %v152_v24 = vld [vmem:[#allocation5 + $0x120] sm:$0xff]  ;;  %v153_v26 = vld [vmem:[#allocation5 + $0x128] sm:$0xff]  ;;  %v3387_v28 = vcombine.low %v157_v17, %v161_v18  ;;  %v170_v10 = vld [vmem:[#allocation5 + $0x1b0] sm:$0xff]  ;;  %v3405_v13 = vcombine.low %v174_v62, %v178_v1  ;;  %v3407_v14 = vcombine.low %v175_v2, %v179_v3  ;;  %p4409_p6 = pnand %p4408_p5, %p4402_p2 }
  0x57   :  { %v3378_v29 = vcombine.high %v148_v23, %v152_v24  ;;  %v3380_v30 = vcombine.high %v149_v25, %v153_v26  ;;  %v140_v31 = vld [vmem:[#allocation5 + $0xc0] sm:$0xff]  ;;  %v141_v33 = vld [vmem:[#allocation5 + $0xc8] sm:$0xff]  ;;  %v3377_v35 = vcombine.low %v148_v23, %v152_v24  ;;  %v3379_v36 = vcombine.low %v149_v25, %v153_v26  ;;  %v167_v11 = vld [vmem:[#allocation5 + $0x198] sm:$0xff] }
  0x58   :  { %551 = vmatpush1.bf16.msra.mxu0 %v3393_v19  ;;  %594 = vmatpush1.bf16.msra.mxu1 %v3395_v20  ;;  %v144_v32 = vld [vmem:[#allocation5 + $0xe0] sm:$0xff]  ;;  %v145_v34 = vld [vmem:[#allocation5 + $0xe8] sm:$0xff]  ;;  %v171_v12 = vld [vmem:[#allocation5 + $0x1b8] sm:$0xff]  ;;  %v3398_v15 = vcombine.high %v166_v8, %v170_v10 }
  0x59   :  { %552 = vmatprep.subr.bf16.mxu0 %v3386_v21  ;;  %595 = vmatprep.subr.bf16.mxu1 %v3388_v22  ;;  %v3370_v37 = vcombine.high %v140_v31, %v144_v32  ;;  %v3372_v38 = vcombine.high %v141_v33, %v145_v34  ;;  %v132_v39 = vld [vmem:[#allocation5 + $0x80] sm:$0xff]  ;;  %v133_v41 = vld [vmem:[#allocation5 + $0x88] sm:$0xff]  ;;  %v3369_v43 = vcombine.low %v140_v31, %v144_v32  ;;  %v158_v16 = vld [vmem:[#allocation5 + $0x150] sm:$0xff] }
  0x5a   :  { %v136_v40 = vld [vmem:[#allocation5 + $0xa0] sm:$0xff]  ;;  %v137_v42 = vld [vmem:[#allocation5 + $0xa8] sm:$0xff]  ;;  %v3371_v44 = vcombine.low %v141_v33, %v145_v34  ;;  %v3400_v17 = vcombine.high %v167_v11, %v171_v12  ;;  %v162_v18 = vld [vmem:[#allocation5 + $0x170] sm:$0xff]  ;;  %v3397_v21 = vcombine.low %v166_v8, %v170_v10  ;;  %v3399_v22 = vcombine.low %v167_v11, %v171_v12 }
  0x5b   :  { %v3362_v45 = vcombine.high %v132_v39, %v136_v40  ;;  %v3364_v46 = vcombine.high %v133_v41, %v137_v42  ;;  %v124_v47 = vld [vmem:[#allocation5 + $0x40] sm:$0xff]  ;;  %v125_v49 = vld [vmem:[#allocation5 + $0x48] sm:$0xff]  ;;  %v3361_v51 = vcombine.low %v132_v39, %v136_v40  ;;  %v3363_v52 = vcombine.low %v133_v41, %v137_v42  ;;  %v159_v19 = vld [vmem:[#allocation5 + $0x158] sm:$0xff] }
  0x5c   :  { %553 = vmatpush1.bf16.msra.mxu0 %v3385_v27  ;;  %596 = vmatpush1.bf16.msra.mxu1 %v3387_v28  ;;  %v128_v48 = vld [vmem:[#allocation5 + $0x60] sm:$0xff]  ;;  %v129_v50 = vld [vmem:[#allocation5 + $0x68] sm:$0xff]  ;;  %v163_v20 = vld [vmem:[#allocation5 + $0x178] sm:$0xff]  ;;  %v3390_v23 = vcombine.high %v158_v16, %v162_v18 }
  0x5d   :  { %554 = vmatprep.subr.bf16.mxu0 %v3378_v29  ;;  %597 = vmatprep.subr.bf16.mxu1 %v3380_v30  ;;  %v3354_v53 = vcombine.high %v124_v47, %v128_v48  ;;  %v116_v54 = vld [vmem:[#allocation5] sm:$0xff]  ;;  %v3356_v55 = vcombine.high %v125_v49, %v129_v50  ;;  %v117_v57 = vld [vmem:[#allocation5 + $0x8] sm:$0xff]  ;;  %v3353_v59 = vcombine.low %v124_v47, %v128_v48  ;;  %v150_v24 = vld [vmem:[#allocation5 + $0x110] sm:$0xff] }
  0x5e   :  { %v120_v56 = vld [vmem:[#allocation5 + $0x20] sm:$0xff]  ;;  %v121_v58 = vld [vmem:[#allocation5 + $0x28] sm:$0xff]  ;;  %v3355_v60 = vcombine.low %v125_v49, %v129_v50  ;;  %v3392_v25 = vcombine.high %v159_v19, %v163_v20  ;;  %v154_v26 = vld [vmem:[#allocation5 + $0x130] sm:$0xff]  ;;  %v3389_v29 = vcombine.low %v158_v16, %v162_v18  ;;  %v3391_v30 = vcombine.low %v159_v19, %v163_v20 }
  0x5f   :  { %v3346_v61 = vcombine.high %v116_v54, %v120_v56  ;;  %v3348_v63 = vcombine.high %v117_v57, %v121_v58  ;;  %v3345_v4 = vcombine.low %v116_v54, %v120_v56  ;;  %v3347_v5 = vcombine.low %v117_v57, %v121_v58  ;;  %v151_v27 = vld [vmem:[#allocation5 + $0x118] sm:$0xff]  ;;  %v142_v32 = vld [vmem:[#allocation5 + $0xd0] sm:$0xff] }
  0x60   :  { %555 = vmatpush1.bf16.msra.mxu0 %v3377_v35  ;;  %598 = vmatpush1.bf16.msra.mxu1 %v3379_v36  ;;  %v155_v28 = vld [vmem:[#allocation5 + $0x138] sm:$0xff]  ;;  %v3382_v31 = vcombine.high %v150_v24, %v154_v26  ;;  %v146_v34 = vld [vmem:[#allocation5 + $0xf0] sm:$0xff] }
  0x61   :  { %556 = vmatprep.subr.bf16.mxu0 %v3370_v37  ;;  %599 = vmatprep.subr.bf16.mxu1 %v3372_v38  ;;  %v3384_v33 = vcombine.high %v151_v27, %v155_v28  ;;  %v143_v35 = vld [vmem:[#allocation5 + $0xd8] sm:$0xff]  ;;  %v3381_v37 = vcombine.low %v150_v24, %v154_v26  ;;  %v3383_v38 = vcombine.low %v151_v27, %v155_v28  ;;  %v134_v40 = vld [vmem:[#allocation5 + $0x90] sm:$0xff] }
  0x62   :  { %v147_v36 = vld [vmem:[#allocation5 + $0xf8] sm:$0xff]  ;;  %v3374_v39 = vcombine.high %v142_v32, %v146_v34  ;;  %v138_v41 = vld [vmem:[#allocation5 + $0xb0] sm:$0xff] }
  0x63   :  { %v135_v42 = vld [vmem:[#allocation5 + $0x98] sm:$0xff]  ;;  %v126_v47 = vld [vmem:[#allocation5 + $0x50] sm:$0xff] }
  0x64   :  { %557 = vmatpush1.bf16.msra.mxu0 %v3369_v43  ;;  %600 = vmatpush1.bf16.msra.mxu1 %v3371_v44  ;;  %v139_v43 = vld [vmem:[#allocation5 + $0xb8] sm:$0xff]  ;;  %v3373_v44 = vcombine.low %v142_v32, %v146_v34  ;;  %v130_v49 = vld [vmem:[#allocation5 + $0x70] sm:$0xff] }
  0x65   :  { %558 = vmatprep.subr.bf16.mxu0 %v3362_v45  ;;  %601 = vmatprep.subr.bf16.mxu1 %v3364_v46  ;;  %v3375_v45 = vcombine.low %v143_v35, %v147_v36  ;;  %v3366_v46 = vcombine.high %v134_v40, %v138_v41  ;;  %v3368_v48 = vcombine.high %v135_v42, %v139_v43  ;;  %v127_v50 = vld [vmem:[#allocation5 + $0x58] sm:$0xff]  ;;  %v122_v57 = vld [vmem:[#allocation5 + $0x30] sm:$0xff] }
  0x66   :  { %v3358_v54 = vcombine.high %v126_v47, %v130_v49  ;;  %v119_v58 = vld [vmem:[#allocation5 + $0x18] sm:$0xff] }
  0x67   :  { %v3787_v1 = vld [vmem:[#allocation8 + $0xe4] ss:$16 sps:$4 sm:$0xff]   ;;  %v3791_v10 = vld [vmem:[#allocation8 + $0xc0] ss:$16 sps:$4 sm:$0xff]  }
  0x68   :  { %559 = vmatpush1.bf16.msra.mxu0 %v3361_v51  ;;  %602 = vmatpush1.bf16.msra.mxu1 %v3363_v52  ;;  %v131_v51 = vld [vmem:[#allocation5 + $0x78] sm:$0xff]  ;;  %v3365_v52 = vcombine.low %v134_v40, %v138_v41 }
  0x69   :  { %560 = vmatprep.subr.bf16.mxu0 %v3354_v53  ;;  %603 = vmatprep.subr.bf16.mxu1 %v3356_v55  ;;  %v3367_v53 = vcombine.low %v135_v42, %v139_v43  ;;  %v118_v55 = vld [vmem:[#allocation5 + $0x10] sm:$0xff]  ;;  %v3360_v56 = vcombine.high %v127_v50, %v131_v51  ;;  %v3790_v3 = vld [vmem:[#allocation8 + $0x2e4] ss:$16 sps:$4 sm:$0xff]   ;;  %v3794_v11 = vld [vmem:[#allocation8 + $0x2c0] ss:$16 sps:$4 sm:$0xff]  }
  0x6a   :  { %v3350_v62 = vcombine.high %v118_v55, %v122_v57  ;;  %v3349_v2 = vcombine.low %v118_v55, %v122_v57  ;;  %v3793_v8 = vld [vmem:[#allocation8 + $0xc4] ss:$16 sps:$4 sm:$0xff]   ;;  %v3803_v18 = vld [vmem:[#allocation8 + $0x80] ss:$16 sps:$4 sm:$0xff]  }
  0x6b   :  { %v3799_v12 = vld [vmem:[#allocation8 + $0xa4] ss:$16 sps:$4 sm:$0xff]   ;;  %v3806_v19 = vld [vmem:[#allocation8 + $0x280] ss:$16 sps:$4 sm:$0xff]  }
  0x6c   :  { %561 = vmatpush1.bf16.msra.mxu0 %v3353_v59  ;;  %604 = vmatpush1.bf16.msra.mxu1 %v3355_v60  ;;  %v123_v59 = vld [vmem:[#allocation5 + $0x38] sm:$0xff]  ;;  %v3357_v60 = vcombine.low %v126_v47, %v130_v49 }
  0x6d   :  { %562 = vmatprep.subr.bf16.mxu0 %v3346_v61  ;;  %605 = vmatprep.subr.bf16.mxu1 %v3348_v63  ;;  %v3359_v61 = vcombine.low %v127_v50, %v131_v51  ;;  %v3352_v63 = vcombine.high %v119_v58, %v123_v59  ;;  %v3805_v16 = vld [vmem:[#allocation8 + $0x84] ss:$16 sps:$4 sm:$0xff]   ;;  %v3818_v26 = vld [vmem:[#allocation8 + $0x240] ss:$16 sps:$4 sm:$0xff]  }
  0x6e   :  { %v3811_v20 = vld [vmem:[#allocation8 + $0x64] ss:$16 sps:$4 sm:$0xff]   ;;  %v3830_v34 = vld [vmem:[#allocation8 + $0x200] ss:$16 sps:$4 sm:$0xff]  }
  0x6f   :  { %v3820_v24 = vld [vmem:[#allocation8 + $0x244] ss:$16 sps:$4 sm:$0xff]   ;;  %v3842_v41 = vld [vmem:[#allocation8 + $0x3c0] ss:$16 sps:$4 sm:$0xff]  }
  0x70   :  { %563 = vmatpush1.bf16.msra.mxu0 %v3345_v4  ;;  %606 = vmatpush1.bf16.msra.mxu1 %v3347_v5  ;;  %v3351_v4 = vcombine.low %v119_v58, %v123_v59  ;;  %v3785_v5 = vld [vmem:[#allocation8 + $0xe0] ss:$16 sps:$4 sm:$0xff]   ;;  %v3823_v27 = vld [vmem:[#allocation8 + $0x24] ss:$16 sps:$4 sm:$0xff]  }
  0x71   :  { %634 = vmatprep.subr.bf16.mxu0 %v3406_v7  ;;  %677 = vmatprep.subr.bf16.mxu1 %v3408_v9  ;;  %v3788_v7 = vld [vmem:[#allocation8 + $0x2e0] ss:$16 sps:$4 sm:$0xff]   ;;  %v3796_v9 = vld [vmem:[#allocation8 + $0x2c4] ss:$16 sps:$4 sm:$0xff]  }
  0x72   :  { %v3826_v28 = vld [vmem:[#allocation8 + $0x224] ss:$16 sps:$4 sm:$0xff]   ;;  %v3854_v49 = vld [vmem:[#allocation8 + $0x380] ss:$16 sps:$4 sm:$0xff]  }
  0x73   :  { %581 = vmatmul.mubr.bf16.vlgmr.msra.gmra.mxu0 %v4526_v6  ;;  %624 = vmatmul.mubr.bf16.vlgmr.msra.gmra.mxu1 %v4526_v6  ;;  %v3832_v32 = vld [vmem:[#allocation8 + $0x204] ss:$16 sps:$4 sm:$0xff]   ;;  %v3866_v57 = vld [vmem:[#allocation8 + $0x340] ss:$16 sps:$4 sm:$0xff]  }
  0x74   :  { %635 = vmatpush1.bf16.msra.mxu0 %v3405_v13  ;;  %678 = vmatpush1.bf16.msra.mxu1 %v3407_v14  ;;  %v3802_v13 = vld [vmem:[#allocation8 + $0x2a4] ss:$16 sps:$4 sm:$0xff]   ;;  %v3797_v14 = vld [vmem:[#allocation8 + $0xa0] ss:$16 sps:$4 sm:$0xff]  }
  0x75   :  { %636 = vmatprep.subr.bf16.mxu0 %v3398_v15  ;;  %679 = vmatprep.subr.bf16.mxu1 %v3400_v17  ;;  %v3800_v15 = vld [vmem:[#allocation8 + $0x2a0] ss:$16 sps:$4 sm:$0xff]   ;;  %v3808_v17 = vld [vmem:[#allocation8 + $0x284] ss:$16 sps:$4 sm:$0xff]  }
  0x76   :  { %666 = vmatprep.mubr.bf16.mxu0 %v4445_v0  ;;  %709 = vmatprep.mubr.bf16.mxu1 %v4445_v0  ;;  %v3376_v0 = vcombine.high %v143_v35, %v147_v36  ;;  %v3835_v35 = vld [vmem:[#allocation8 + $0x1e4] ss:$16 sps:$4 sm:$0xff]  }
  0x77   :  { %v3838_v36 = vld [vmem:[#allocation8 + $0x3e4] ss:$16 sps:$4 sm:$0xff]  }
  0x78   :  { %637 = vmatpush1.bf16.msra.mxu0 %v3397_v21  ;;  %680 = vmatpush1.bf16.msra.mxu1 %v3399_v22  ;;  %v3814_v21 = vld [vmem:[#allocation8 + $0x264] ss:$16 sps:$4 sm:$0xff]   ;;  %v3812_v22 = vld [vmem:[#allocation8 + $0x260] ss:$16 sps:$4 sm:$0xff]  }
  0x79   :  { %638 = vmatprep.subr.bf16.mxu0 %v3390_v23  ;;  %681 = vmatprep.subr.bf16.mxu1 %v3392_v25  ;;  %v3817_v23 = vld [vmem:[#allocation8 + $0x44] ss:$16 sps:$4 sm:$0xff]   ;;  %v3815_v25 = vld [vmem:[#allocation8 + $0x40] ss:$16 sps:$4 sm:$0xff]  }
  0x7a   :  { %v3844_v40 = vld [vmem:[#allocation8 + $0x3c4] ss:$16 sps:$4 sm:$0xff]  }
  0x7b   :  { %v3847_v42 = vld [vmem:[#allocation8 + $0x1a4] ss:$16 sps:$4 sm:$0xff]  }
  0x7c   :  { %639 = vmatpush1.bf16.msra.mxu0 %v3389_v29  ;;  %682 = vmatpush1.bf16.msra.mxu1 %v3391_v30  ;;  %v3821_v29 = vld [vmem:[#allocation8 + $0x20] ss:$16 sps:$4 sm:$0xff]   ;;  %v3850_v43 = vld [vmem:[#allocation8 + $0x3a4] ss:$16 sps:$4 sm:$0xff]  }
  0x7d   :  { %640 = vmatprep.subr.bf16.mxu0 %v3382_v31  ;;  %683 = vmatprep.subr.bf16.mxu1 %v3384_v33  ;;  %v3824_v30 = vld [vmem:[#allocation8 + $0x220] ss:$16 sps:$4 sm:$0xff]   ;;  %v3829_v31 = vld [vmem:[#allocation8 + $0x4] ss:$16 sps:$4 sm:$0xff]  }
  0x7e   :  { %v3827_v33 = vld [vmem:[#allocation8] ss:$16 sps:$4 sm:$0xff]   ;;  %v3856_v47 = vld [vmem:[#allocation8 + $0x384] ss:$16 sps:$4 sm:$0xff]  }
  0x7f   :  { %v3859_v50 = vld [vmem:[#allocation8 + $0x164] ss:$16 sps:$4 sm:$0xff]  }
  0x80   :  { %641 = vmatpush1.bf16.msra.mxu0 %v3381_v37  ;;  %684 = vmatpush1.bf16.msra.mxu1 %v3383_v38  ;;  %v3833_v37 = vld [vmem:[#allocation8 + $0x1e0] ss:$16 sps:$4 sm:$0xff]   ;;  %v3862_v51 = vld [vmem:[#allocation8 + $0x364] ss:$16 sps:$4 sm:$0xff]  }
  0x81   :  { %642 = vmatprep.subr.bf16.mxu0 %v3374_v39  ;;  %685 = vmatprep.subr.bf16.mxu1 %v3376_v0  ;;  %v3836_v38 = vld [vmem:[#allocation8 + $0x3e0] ss:$16 sps:$4 sm:$0xff]   ;;  %v3841_v39 = vld [vmem:[#allocation8 + $0x1c4] ss:$16 sps:$4 sm:$0xff]  }
  0x82   :  { %v3839_v0 = vld [vmem:[#allocation8 + $0x1c0] ss:$16 sps:$4 sm:$0xff]   ;;  %v3868_v55 = vld [vmem:[#allocation8 + $0x344] ss:$16 sps:$4 sm:$0xff]  }
  0x83   :  { %v3871_v58 = vld [vmem:[#allocation8 + $0x124] ss:$16 sps:$4 sm:$0xff]  }
  0x84   :  { %643 = vmatpush1.bf16.msra.mxu0 %v3373_v44  ;;  %686 = vmatpush1.bf16.msra.mxu1 %v3375_v45  ;;  %v3845_v44 = vld [vmem:[#allocation8 + $0x1a0] ss:$16 sps:$4 sm:$0xff]   ;;  %v3874_v59 = vld [vmem:[#allocation8 + $0x324] ss:$16 sps:$4 sm:$0xff]  }
  0x85   :  { %644 = vmatprep.subr.bf16.mxu0 %v3366_v46  ;;  %687 = vmatprep.subr.bf16.mxu1 %v3368_v48  ;;  %v3848_v45 = vld [vmem:[#allocation8 + $0x3a0] ss:$16 sps:$4 sm:$0xff]   ;;  %v3853_v46 = vld [vmem:[#allocation8 + $0x184] ss:$16 sps:$4 sm:$0xff]  }
  0x86   :  { %v3851_v48 = vld [vmem:[#allocation8 + $0x180] ss:$16 sps:$4 sm:$0xff]  }
  0x88   :  { %645 = vmatpush1.bf16.msra.mxu0 %v3365_v52  ;;  %688 = vmatpush1.bf16.msra.mxu1 %v3367_v53  ;;  %v3857_v52 = vld [vmem:[#allocation8 + $0x160] ss:$16 sps:$4 sm:$0xff]  }
  0x89   :  { %646 = vmatprep.subr.bf16.mxu0 %v3358_v54  ;;  %689 = vmatprep.subr.bf16.mxu1 %v3360_v56  ;;  %v3860_v53 = vld [vmem:[#allocation8 + $0x360] ss:$16 sps:$4 sm:$0xff]   ;;  %v3865_v54 = vld [vmem:[#allocation8 + $0x144] ss:$16 sps:$4 sm:$0xff]  }
  0x8a   :  { %v3863_v56 = vld [vmem:[#allocation8 + $0x140] ss:$16 sps:$4 sm:$0xff]  }
  0x8c   :  { %647 = vmatpush1.bf16.msra.mxu0 %v3357_v60  ;;  %690 = vmatpush1.bf16.msra.mxu1 %v3359_v61  ;;  %v3869_v60 = vld [vmem:[#allocation8 + $0x120] ss:$16 sps:$4 sm:$0xff]  }
  0x8d   :  { %648 = vmatprep.subr.bf16.mxu0 %v3350_v62  ;;  %691 = vmatprep.subr.bf16.mxu1 %v3352_v63  ;;  %v3872_v61 = vld [vmem:[#allocation8 + $0x320] ss:$16 sps:$4 sm:$0xff]   ;;  %v3877_v62 = vld [vmem:[#allocation8 + $0x104] ss:$16 sps:$4 sm:$0xff]  }
  0x8e   :  { %v3880_v63 = vld [vmem:[#allocation8 + $0x304] ss:$16 sps:$4 sm:$0xff]  }
  0x90   :  { %649 = vmatpush1.bf16.msra.mxu0 %v3349_v2  ;;  %692 = vmatpush1.bf16.msra.mxu1 %v3351_v4  ;;  %v3878_v2 = vld [vmem:[#allocation8 + $0x300] ss:$16 sps:$4 sm:$0xff]   ;;  %v3886_v4 = vld [vmem:[#allocation8 + $0x6e4] ss:$16 sps:$4 sm:$0xff]  }
  0x91   :  { %2302 = vmatprep.subr.bf16.mxu0 %v3787_v1  ;;  %2345 = vmatprep.subr.bf16.mxu1 %v3790_v3  ;;  %v3875_v1 = vld [vmem:[#allocation8 + $0x100] ss:$16 sps:$4 sm:$0xff]   ;;  %v3883_v3 = vld [vmem:[#allocation8 + $0x4e4] ss:$16 sps:$4 sm:$0xff]  }
  0x93   :  { %667 = vmatmul.mubr.bf16.vlgmr.msra.gmra.mxu0 %v4526_v6  ;;  %710 = vmatmul.mubr.bf16.vlgmr.msra.gmra.mxu1 %v4526_v6  ;;  %v3809_v6 = vld [vmem:[#allocation8 + $0x60] ss:$16 sps:$4 sm:$0xff]  }
  0x94   :  { %2303 = vmatpush1.bf16.msra.mxu0 %v3785_v5  ;;  %2346 = vmatpush1.bf16.msra.mxu1 %v3788_v7  ;;  %v182_v5 = vlaneseq }
  0x95   :  { %2304 = vmatprep.subr.bf16.mxu0 %v3793_v8  ;;  %2347 = vmatprep.subr.bf16.mxu1 %v3796_v9 }
  0x96   :  { %v4534_v7 = vshrl.u32 %v182_v5, 7  ;;  %v3919_v5 = vld [vmem:[#allocation8 + $0x424] ss:$16 sps:$4 sm:$0xff]  }
  0x98   :  { %2305 = vmatpush1.bf16.msra.mxu0 %v3791_v10  ;;  %2348 = vmatpush1.bf16.msra.mxu1 %v3794_v11  ;;  %v4537_v8 = vsub.s32 1, %v4534_v7  ;;  %v4540_v9 = vsub.s32 0, %v4534_v7  ;;  %v196_v10 = vsub.s32 3, %v4534_v7  ;;  %v4543_v11 = vld [vmem:[#allocation7] sm:$0xff] }
  0x99   :  { %2306 = vmatprep.subr.bf16.mxu0 %v3799_v12  ;;  %2349 = vmatprep.subr.bf16.mxu1 %v3802_v13  ;;  %v192_v12 = vsub.s32 2, %v4534_v7 }
  0x9c   :  { %2307 = vmatpush1.bf16.msra.mxu0 %v3797_v14  ;;  %2350 = vmatpush1.bf16.msra.mxu1 %v3800_v15  ;;  %v189_v15 = vrot.slane %v4543_v11, %v4537_v8 }
  0x9d   :  { %2308 = vmatprep.subr.bf16.mxu0 %v3805_v16  ;;  %2351 = vmatprep.subr.bf16.mxu1 %v3808_v17  ;;  %v185_v16 = vrot.slane %v4543_v11, %v4540_v9 }
  0xa0   :  { %2309 = vmatpush1.bf16.msra.mxu0 %v3803_v18  ;;  %2352 = vmatpush1.bf16.msra.mxu1 %v3806_v19  ;;  %v197_v18 = vrot.slane %v4543_v11, %v196_v10  ;;  %v193_v19 = vrot.slane %v4543_v11, %v192_v12 }
  0xa1   :  { %2310 = vmatprep.subr.bf16.mxu0 %v3811_v20  ;;  %2353 = vmatprep.subr.bf16.mxu1 %v3814_v21 }
  0xa4   :  { %2311 = vmatpush1.bf16.msra.mxu0 %v3809_v6  ;;  %2354 = vmatpush1.bf16.msra.mxu1 %v3812_v22 }
  0xa5   :  { %2312 = vmatprep.subr.bf16.mxu0 %v3817_v23  ;;  %2355 = vmatprep.subr.bf16.mxu1 %v3820_v24 }
  0xa8   :  { %2313 = vmatpush1.bf16.msra.mxu0 %v3815_v25  ;;  %2356 = vmatpush1.bf16.msra.mxu1 %v3818_v26 }
  0xa9   :  { %2314 = vmatprep.subr.bf16.mxu0 %v3823_v27  ;;  %2357 = vmatprep.subr.bf16.mxu1 %v3826_v28 }
  0xac   :  { %2315 = vmatpush1.bf16.msra.mxu0 %v3821_v29  ;;  %2358 = vmatpush1.bf16.msra.mxu1 %v3824_v30 }
  0xad   :  { %2316 = vmatprep.subr.bf16.mxu0 %v3829_v31  ;;  %2359 = vmatprep.subr.bf16.mxu1 %v3832_v32 }
  0xb0   :  { %2317 = vmatpush1.bf16.msra.mxu0 %v3827_v33  ;;  %2360 = vmatpush1.bf16.msra.mxu1 %v3830_v34 }
  0xb1   :  { %2318 = vmatprep.subr.bf16.mxu0 %v3835_v35  ;;  %2361 = vmatprep.subr.bf16.mxu1 %v3838_v36 }
  0xb4   :  { %2319 = vmatpush2.bf16.msra.mxu0 %v3833_v37  ;;  %2362 = vmatpush2.bf16.msra.mxu1 %v3836_v38 }
  0xb5   :  { %2320 = vmatprep.subr.bf16.mxu0 %v3841_v39  ;;  %2363 = vmatprep.subr.bf16.mxu1 %v3844_v40 }
  0xb8   :  { %2321 = vmatpush2.bf16.msra.mxu0 %v3839_v0  ;;  %2364 = vmatpush2.bf16.msra.mxu1 %v3842_v41  ;;  %v3881_v0 = vld [vmem:[#allocation8 + $0x4e0] ss:$16 sps:$4 sm:$0xff]  }
  0xb9   :  { %2322 = vmatprep.subr.bf16.mxu0 %v3847_v42  ;;  %2365 = vmatprep.subr.bf16.mxu1 %v3850_v43  ;;  %v3884_v43 = vld [vmem:[#allocation8 + $0x6e0] ss:$16 sps:$4 sm:$0xff]  }
  0xbc   :  { %2323 = vmatpush2.bf16.msra.mxu0 %v3845_v44  ;;  %2366 = vmatpush2.bf16.msra.mxu1 %v3848_v45  ;;  %v3889_v44 = vld [vmem:[#allocation8 + $0x4c4] ss:$16 sps:$4 sm:$0xff]  }
  0xbd   :  { %2324 = vmatprep.subr.bf16.mxu0 %v3853_v46  ;;  %2367 = vmatprep.subr.bf16.mxu1 %v3856_v47  ;;  %v3892_v46 = vld [vmem:[#allocation8 + $0x6c4] ss:$16 sps:$4 sm:$0xff]   ;;  %v3887_v47 = vld [vmem:[#allocation8 + $0x4c0] ss:$16 sps:$4 sm:$0xff]  }
  0xc0   :  { %2325 = vmatpush2.bf16.msra.mxu0 %v3851_v48  ;;  %2368 = vmatpush2.bf16.msra.mxu1 %v3854_v49  ;;  %v3890_v48 = vld [vmem:[#allocation8 + $0x6c0] ss:$16 sps:$4 sm:$0xff]   ;;  %v3895_v49 = vld [vmem:[#allocation8 + $0x4a4] ss:$16 sps:$4 sm:$0xff]  }
  0xc1   :  { %2326 = vmatprep.subr.bf16.mxu0 %v3859_v50  ;;  %2369 = vmatprep.subr.bf16.mxu1 %v3862_v51  ;;  %v3898_v50 = vld [vmem:[#allocation8 + $0x6a4] ss:$16 sps:$4 sm:$0xff]   ;;  %v3893_v51 = vld [vmem:[#allocation8 + $0x4a0] ss:$16 sps:$4 sm:$0xff]  }
  0xc4   :  { %2327 = vmatpush2.bf16.msra.mxu0 %v3857_v52  ;;  %2370 = vmatpush2.bf16.msra.mxu1 %v3860_v53  ;;  %v3896_v52 = vld [vmem:[#allocation8 + $0x6a0] ss:$16 sps:$4 sm:$0xff]   ;;  %v3901_v53 = vld [vmem:[#allocation8 + $0x484] ss:$16 sps:$4 sm:$0xff]  }
  0xc5   :  { %2328 = vmatprep.subr.bf16.mxu0 %v3865_v54  ;;  %2371 = vmatprep.subr.bf16.mxu1 %v3868_v55  ;;  %v3904_v54 = vld [vmem:[#allocation8 + $0x684] ss:$16 sps:$4 sm:$0xff]   ;;  %v3899_v55 = vld [vmem:[#allocation8 + $0x480] ss:$16 sps:$4 sm:$0xff]  }
  0xc8   :  { %2329 = vmatpush2.bf16.msra.mxu0 %v3863_v56  ;;  %2372 = vmatpush2.bf16.msra.mxu1 %v3866_v57  ;;  %v3902_v56 = vld [vmem:[#allocation8 + $0x680] ss:$16 sps:$4 sm:$0xff]   ;;  %v3907_v57 = vld [vmem:[#allocation8 + $0x464] ss:$16 sps:$4 sm:$0xff]  }
  0xc9   :  { %2330 = vmatprep.subr.bf16.mxu0 %v3871_v58  ;;  %2373 = vmatprep.subr.bf16.mxu1 %v3874_v59  ;;  %v3910_v58 = vld [vmem:[#allocation8 + $0x664] ss:$16 sps:$4 sm:$0xff]   ;;  %v3905_v59 = vld [vmem:[#allocation8 + $0x460] ss:$16 sps:$4 sm:$0xff]  }
  0xcc   :  { %2331 = vmatpush2.bf16.msra.mxu0 %v3869_v60  ;;  %2374 = vmatpush2.bf16.msra.mxu1 %v3872_v61  ;;  %v204_v60 = vsub.s32 5, %v4534_v7  ;;  %v3908_v61 = vld [vmem:[#allocation8 + $0x660] ss:$16 sps:$4 sm:$0xff]  }
  0xcd   :  { %2332 = vmatprep.subr.bf16.mxu0 %v3877_v62  ;;  %2375 = vmatprep.subr.bf16.mxu1 %v3880_v63  ;;  %v3913_v62 = vld [vmem:[#allocation8 + $0x444] ss:$16 sps:$4 sm:$0xff]   ;;  %v212_v63 = vsub.s32 7, %v4534_v7 }
  0xd0   :  { %2333 = vmatpush2.bf16.msra.mxu0 %v3875_v1  ;;  %2376 = vmatpush2.bf16.msra.mxu1 %v3878_v2  ;;  %v3916_v1 = vld [vmem:[#allocation8 + $0x644] ss:$16 sps:$4 sm:$0xff]   ;;  %v3911_v2 = vld [vmem:[#allocation8 + $0x440] ss:$16 sps:$4 sm:$0xff]  }
  0xd1   :  { %2388 = vmatprep.subr.bf16.mxu0 %v3883_v3  ;;  %2431 = vmatprep.subr.bf16.mxu1 %v3886_v4  ;;  %v205_v3 = vrot.slane %v4543_v11, %v204_v60  ;;  %v3914_v4 = vld [vmem:[#allocation8 + $0x640] ss:$16 sps:$4 sm:$0xff]   ;;  %v200_v60 = vsub.s32 4, %v4534_v7 }
 0x133   :  { %v582_v13 = vpop.f32.mrf.mxu0  ;;  %v625_v14 = vpop.f32.mrf.mxu1 }
 0x134   :  { %v583_v24 = vadd.f32 %v582_v13, %v185_v16  ;;  %v626_v28 = vadd.f32 %v625_v14, %v193_v19  ;;  %v213_v14 = vrot.slane %v4543_v11, %v212_v63  ;;  %v208_v63 = vsub.s32 6, %v4534_v7 }
 0x135   :  { %v584_v17 = vpop.f32.mrf.mxu0  ;;  %v627_v20 = vpop.f32.mrf.mxu1 }
 0x136   :  { %v585_v6 = vadd.f32 %v584_v17, %v189_v15  ;;  %v628_v25 = vadd.f32 %v627_v20, %v197_v18  ;;  %v720_v36 = vmax.f32 %v583_v24, 0.0  ;;  %v722_v39 = vmax.f32 %v626_v28, 0.0  ;;  %v3928_v24 = vld [vmem:[#allocation8 + $0x604] ss:$16 sps:$4 sm:$0xff]  }
 0x137   :  { %v586_v21 = vpop.f32.mrf.mxu0  ;;  %v629_v23 = vpop.f32.mrf.mxu1 }
 0x138   :  { %v587_v22 = vadd.f32 %v586_v21, %v185_v16  ;;  %v630_v26 = vadd.f32 %v629_v23, %v193_v19  ;;  %v721_v33 = vmax.f32 %v585_v6, 0.0  ;;  %v723_v37 = vmax.f32 %v628_v25, 0.0  ;;  %v3920_v21 = vld [vmem:[#allocation8 + $0x620] ss:$16 sps:$4 sm:$0xff]   ;;  %v3925_v6 = vld [vmem:[#allocation8 + $0x404] ss:$16 sps:$4 sm:$0xff]  }
 0x139   :  { %v588_v27 = vpop.f32.mrf.mxu0  ;;  %v631_v30 = vpop.f32.mrf.mxu1 }
 0x13a   :  { %v589_v29 = vadd.f32 %v588_v27, %v189_v15  ;;  %v728_v31 = vmax.f32 %v587_v22, 0.0  ;;  %v632_v32 = vadd.f32 %v631_v30, %v197_v18  ;;  %v730_v34 = vmax.f32 %v630_v26, 0.0  ;;  %v3922_v15 = vld [vmem:[#allocation8 + $0x624] ss:$16 sps:$4 sm:$0xff]   ;;  %v3917_v18 = vld [vmem:[#allocation8 + $0x420] ss:$16 sps:$4 sm:$0xff]  }
 0x13b   :  { %v3923_v27 = vld [vmem:[#allocation8 + $0x400] ss:$16 sps:$4 sm:$0xff]  }
 0x13c   :  { %v729_v35 = vmax.f32 %v589_v29, 0.0  ;;  %v731_v38 = vmax.f32 %v632_v32, 0.0  ;;  %v4558_v41 = vpack.c.bf16 %v728_v31, %v720_v36  ;;  %v4562_v45 = vpack.c.bf16 %v730_v34, %v722_v39  ;;  %v3926_v31 = vld [vmem:[#allocation8 + $0x600] ss:$16 sps:$4 sm:$0xff]   ;;  %v3931_v32 = vld [vmem:[#allocation8 + $0x5e4] ss:$16 sps:$4 sm:$0xff]  }
 0x13e   :  { %v4556_v40 = vpack.c.bf16 %v729_v35, %v721_v33  ;;  %v4560_v42 = vpack.c.bf16 %v731_v38, %v723_v37  ;;  %v3934_v35 = vld [vmem:[#allocation8 + $0x7e4] ss:$16 sps:$4 sm:$0xff]   ;;  %v3929_v38 = vld [vmem:[#allocation8 + $0x5e0] ss:$16 sps:$4 sm:$0xff]  }
 0x140   :  { %2334 = vmatprep.mubr.bf16.mxu0 %v4556_v40  ;;  %2377 = vmatprep.mubr.bf16.mxu1 %v4560_v42 }
 0x141   :  { %2335 = vmatmul.mubr.bf16.vlgmr.msra.gmra.mxu0 %v4558_v41  ;;  %2378 = vmatmul.mubr.bf16.vlgmr.msra.gmra.mxu1 %v4562_v45 }
 0x142   :  { %2389 = vmatpush1.bf16.msra.mxu0 %v3881_v0  ;;  %2432 = vmatpush1.bf16.msra.mxu1 %v3884_v43  ;;  %v3932_v0 = vld [vmem:[#allocation8 + $0x7e0] ss:$16 sps:$4 sm:$0xff]   ;;  %v3937_v43 = vld [vmem:[#allocation8 + $0x5c4] ss:$16 sps:$4 sm:$0xff]  }
 0x143   :  { %2390 = vmatprep.subr.bf16.mxu0 %v3889_v44  ;;  %2433 = vmatprep.subr.bf16.mxu1 %v3892_v46  ;;  %v3940_v46 = vld [vmem:[#allocation8 + $0x7c4] ss:$16 sps:$4 sm:$0xff]  }
 0x146   :  { %2391 = vmatpush1.bf16.msra.mxu0 %v3887_v47  ;;  %2434 = vmatpush1.bf16.msra.mxu1 %v3890_v48  ;;  %v3935_v47 = vld [vmem:[#allocation8 + $0x5c0] ss:$16 sps:$4 sm:$0xff]  }
 0x147   :  { %2392 = vmatprep.subr.bf16.mxu0 %v3895_v49  ;;  %2435 = vmatprep.subr.bf16.mxu1 %v3898_v50  ;;  %v3938_v48 = vld [vmem:[#allocation8 + $0x7c0] ss:$16 sps:$4 sm:$0xff]   ;;  %v3943_v49 = vld [vmem:[#allocation8 + $0x5a4] ss:$16 sps:$4 sm:$0xff]  }
 0x148   :  { %v3946_v50 = vld [vmem:[#allocation8 + $0x7a4] ss:$16 sps:$4 sm:$0xff]  }
 0x14a   :  { %2393 = vmatpush1.bf16.msra.mxu0 %v3893_v51  ;;  %2436 = vmatpush1.bf16.msra.mxu1 %v3896_v52  ;;  %v3941_v51 = vld [vmem:[#allocation8 + $0x5a0] ss:$16 sps:$4 sm:$0xff]  }
 0x14b   :  { %2394 = vmatprep.subr.bf16.mxu0 %v3901_v53  ;;  %2437 = vmatprep.subr.bf16.mxu1 %v3904_v54  ;;  %v3944_v52 = vld [vmem:[#allocation8 + $0x7a0] ss:$16 sps:$4 sm:$0xff]   ;;  %v3949_v53 = vld [vmem:[#allocation8 + $0x584] ss:$16 sps:$4 sm:$0xff]  }
 0x14c   :  { %v3952_v54 = vld [vmem:[#allocation8 + $0x784] ss:$16 sps:$4 sm:$0xff]  }
 0x14e   :  { %2395 = vmatpush1.bf16.msra.mxu0 %v3899_v55  ;;  %2438 = vmatpush1.bf16.msra.mxu1 %v3902_v56  ;;  %v3947_v55 = vld [vmem:[#allocation8 + $0x580] ss:$16 sps:$4 sm:$0xff]  }
 0x14f   :  { %2396 = vmatprep.subr.bf16.mxu0 %v3907_v57  ;;  %2439 = vmatprep.subr.bf16.mxu1 %v3910_v58  ;;  %v3950_v56 = vld [vmem:[#allocation8 + $0x780] ss:$16 sps:$4 sm:$0xff]   ;;  %v3955_v57 = vld [vmem:[#allocation8 + $0x564] ss:$16 sps:$4 sm:$0xff]  }
 0x150   :  { %v3958_v58 = vld [vmem:[#allocation8 + $0x764] ss:$16 sps:$4 sm:$0xff]  }
 0x152   :  { %2397 = vmatpush1.bf16.msra.mxu0 %v3905_v59  ;;  %2440 = vmatpush1.bf16.msra.mxu1 %v3908_v61  ;;  %v3953_v59 = vld [vmem:[#allocation8 + $0x560] ss:$16 sps:$4 sm:$0xff]  }
 0x153   :  { %2398 = vmatprep.subr.bf16.mxu0 %v3913_v62  ;;  %v4571_v13 = vpop.f32.mrf.mxu0  ;;  %2441 = vmatprep.subr.bf16.mxu1 %v3916_v1  ;;  %v4574_v16 = vpop.f32.mrf.mxu1  ;;  %v3956_v61 = vld [vmem:[#allocation8 + $0x760] ss:$16 sps:$4 sm:$0xff]   ;;  %v3961_v62 = vld [vmem:[#allocation8 + $0x544] ss:$16 sps:$4 sm:$0xff]  }
 0x154   :  { %v3964_v1 = vld [vmem:[#allocation8 + $0x744] ss:$16 sps:$4 sm:$0xff]  }
 0x155   :  { %v670_v17 = vpop.f32.mrf.mxu0  ;;  %v713_v20 = vpop.f32.mrf.mxu1 }
 0x156   :  { %2399 = vmatpush1.bf16.msra.mxu0 %v3911_v2  ;;  %v671_v19 = vadd.f32 %v670_v17, %v205_v3  ;;  %2442 = vmatpush1.bf16.msra.mxu1 %v3914_v4  ;;  %v714_v23 = vadd.f32 %v713_v20, %v213_v14  ;;  %v3959_v2 = vld [vmem:[#allocation8 + $0x540] ss:$16 sps:$4 sm:$0xff]  }
 0x157   :  { %2400 = vmatprep.subr.bf16.mxu0 %v3919_v5  ;;  %v4576_v22 = vpop.f32.mrf.mxu0  ;;  %2443 = vmatprep.subr.bf16.mxu1 %v3922_v15  ;;  %v4578_v25 = vpop.f32.mrf.mxu1  ;;  %v3962_v4 = vld [vmem:[#allocation8 + $0x740] ss:$16 sps:$4 sm:$0xff]   ;;  %v3967_v5 = vld [vmem:[#allocation8 + $0x524] ss:$16 sps:$4 sm:$0xff]  }
 0x158   :  { %v725_v28 = vmax.f32 %v671_v19, 0.0  ;;  %v727_v33 = vmax.f32 %v714_v23, 0.0  ;;  %v3970_v15 = vld [vmem:[#allocation8 + $0x724] ss:$16 sps:$4 sm:$0xff]   ;;  %v3965_v17 = vld [vmem:[#allocation8 + $0x520] ss:$16 sps:$4 sm:$0xff]  }
 0x159   :  { %v674_v26 = vpop.f32.mrf.mxu0  ;;  %v717_v30 = vpop.f32.mrf.mxu1  ;;  %v3968_v20 = vld [vmem:[#allocation8 + $0x720] ss:$16 sps:$4 sm:$0xff]  }
 0x15a   :  { %2401 = vmatpush1.bf16.msra.mxu0 %v3917_v18  ;;  %v675_v29 = vadd.f32 %v674_v26, %v205_v3  ;;  %2444 = vmatpush1.bf16.msra.mxu1 %v3920_v21  ;;  %v718_v34 = vadd.f32 %v717_v30, %v213_v14  ;;  %v201_v3 = vrot.slane %v4543_v11, %v200_v60  ;;  %v3973_v21 = vld [vmem:[#allocation8 + $0x504] ss:$16 sps:$4 sm:$0xff]   ;;  %v3982_v30 = vld [vmem:[#allocation8 + $0x2ec] ss:$16 sps:$4 sm:$0xff]  }
 0x15b   :  { %2402 = vmatprep.subr.bf16.mxu0 %v3925_v6  ;;  %2445 = vmatprep.subr.bf16.mxu1 %v3928_v24  ;;  %v209_v14 = vrot.slane %v4543_v11, %v208_v63  ;;  %v3976_v24 = vld [vmem:[#allocation8 + $0x704] ss:$16 sps:$4 sm:$0xff]   ;;  %v3971_v11 = vld [vmem:[#allocation8 + $0x500] ss:$16 sps:$4 sm:$0xff]   ;;  %v4021_v60 = vld [vmem:[#allocation8 + $0xc] ss:$16 sps:$4 sm:$0xff]  }
 0x15c   :  { %v733_v36 = vmax.f32 %v675_v29, 0.0  ;;  %v735_v37 = vmax.f32 %v718_v34, 0.0  ;;  %v669_v18 = vadd.f32 %v4571_v13, %v201_v3  ;;  %v673_v19 = vadd.f32 %v4576_v22, %v201_v3  ;;  %v3979_v13 = vld [vmem:[#allocation8 + $0xec] ss:$16 sps:$4 sm:$0xff]   ;;  %v4022_v63 = vld [vmem:[#allocation8 + $0x208] ss:$16 sps:$4 sm:$0xff]  }
 0x15d   :  { %v712_v6 = vadd.f32 %v4574_v16, %v209_v14  ;;  %v716_v23 = vadd.f32 %v4578_v25, %v209_v14  ;;  %v3980_v16 = vld [vmem:[#allocation8 + $0x2e8] ss:$16 sps:$4 sm:$0xff]   ;;  %v3988_v34 = vld [vmem:[#allocation8 + $0x2cc] ss:$16 sps:$4 sm:$0xff]  }
 0x15e   :  { %2403 = vmatpush1.bf16.msra.mxu0 %v3923_v27  ;;  %v4580_v39 = vpack.c.bf16 %v733_v36, %v725_v28  ;;  %2446 = vmatpush1.bf16.msra.mxu1 %v3926_v31  ;;  %v4582_v44 = vpack.c.bf16 %v735_v37, %v727_v33  ;;  %v724_v26 = vmax.f32 %v669_v18, 0.0  ;;  %v732_v27 = vmax.f32 %v673_v19, 0.0  ;;  %v3974_v28 = vld [vmem:[#allocation8 + $0x700] ss:$16 sps:$4 sm:$0xff]   ;;  %v3977_v31 = vld [vmem:[#allocation8 + $0xe8] ss:$16 sps:$4 sm:$0xff]  }
 0x15f   :  { %2404 = vmatprep.subr.bf16.mxu0 %v3931_v32  ;;  %2447 = vmatprep.subr.bf16.mxu1 %v3934_v35  ;;  %v726_v29 = vmax.f32 %v712_v6, 0.0  ;;  %v734_v22 = vmax.f32 %v716_v23, 0.0  ;;  %v3985_v33 = vld [vmem:[#allocation8 + $0xcc] ss:$16 sps:$4 sm:$0xff]   ;;  %v3983_v35 = vld [vmem:[#allocation8 + $0xc8] ss:$16 sps:$4 sm:$0xff]  }
 0x160   :  { %2420 = vmatprep.mubr.bf16.mxu0 %v4580_v39  ;;  %2463 = vmatprep.mubr.bf16.mxu1 %v4582_v44  ;;  %v4594_v32 = vpack.c.bf16 %v732_v27, %v724_v26  ;;  %v3986_v36 = vld [vmem:[#allocation8 + $0x2c8] ss:$16 sps:$4 sm:$0xff]   ;;  %v3991_v37 = vld [vmem:[#allocation8 + $0xac] ss:$16 sps:$4 sm:$0xff]  }
 0x161   :  { %v4596_v25 = vpack.c.bf16 %v734_v22, %v726_v29  ;;  %v4025_v3 = vld [vmem:[#allocation8 + $0x1e8] ss:$16 sps:$4 sm:$0xff]   ;;  %v4036_v14 = vld [vmem:[#allocation8 + $0x3cc] ss:$16 sps:$4 sm:$0xff]  }
 0x162   :  { %2405 = vmatpush2.bf16.msra.mxu0 %v3929_v38  ;;  %2448 = vmatpush2.bf16.msra.mxu1 %v3932_v0  ;;  %v3994_v38 = vld [vmem:[#allocation8 + $0x2ac] ss:$16 sps:$4 sm:$0xff]   ;;  %v3989_v0 = vld [vmem:[#allocation8 + $0xa8] ss:$16 sps:$4 sm:$0xff]  }
 0x163   :  { %2406 = vmatprep.subr.bf16.mxu0 %v3937_v43  ;;  %2449 = vmatprep.subr.bf16.mxu1 %v3940_v46  ;;  %v3992_v43 = vld [vmem:[#allocation8 + $0x2a8] ss:$16 sps:$4 sm:$0xff]   ;;  %v3997_v46 = vld [vmem:[#allocation8 + $0x8c] ss:$16 sps:$4 sm:$0xff]  }
 0x164   :  { %v4039_v18 = vld [vmem:[#allocation8 + $0x1ac] ss:$16 sps:$4 sm:$0xff]  }
 0x165   :  { %v4042_v19 = vld [vmem:[#allocation8 + $0x3ac] ss:$16 sps:$4 sm:$0xff]  }
 0x166   :  { %2407 = vmatpush2.bf16.msra.mxu0 %v3935_v47  ;;  %2450 = vmatpush2.bf16.msra.mxu1 %v3938_v48  ;;  %v4000_v47 = vld [vmem:[#allocation8 + $0x28c] ss:$16 sps:$4 sm:$0xff]   ;;  %v3995_v48 = vld [vmem:[#allocation8 + $0x88] ss:$16 sps:$4 sm:$0xff]  }
 0x167   :  { %2408 = vmatprep.subr.bf16.mxu0 %v3943_v49  ;;  %2451 = vmatprep.subr.bf16.mxu1 %v3946_v50  ;;  %v4003_v49 = vld [vmem:[#allocation8 + $0x6c] ss:$16 sps:$4 sm:$0xff]  }
 0x168   :  { %v4006_v50 = vld [vmem:[#allocation8 + $0x26c] ss:$16 sps:$4 sm:$0xff]  }
 0x169   :  { %v4045_v6 = vld [vmem:[#allocation8 + $0x18c] ss:$16 sps:$4 sm:$0xff]  }
 0x16a   :  { %2409 = vmatpush2.bf16.msra.mxu0 %v3941_v51  ;;  %2452 = vmatpush2.bf16.msra.mxu1 %v3944_v52  ;;  %v4004_v51 = vld [vmem:[#allocation8 + $0x268] ss:$16 sps:$4 sm:$0xff]   ;;  %v4009_v52 = vld [vmem:[#allocation8 + $0x4c] ss:$16 sps:$4 sm:$0xff]  }
 0x16b   :  { %2410 = vmatprep.subr.bf16.mxu0 %v3949_v53  ;;  %2453 = vmatprep.subr.bf16.mxu1 %v3952_v54  ;;  %v4012_v53 = vld [vmem:[#allocation8 + $0x24c] ss:$16 sps:$4 sm:$0xff]   ;;  %v4007_v54 = vld [vmem:[#allocation8 + $0x48] ss:$16 sps:$4 sm:$0xff]  }
 0x16c   :  { %v4048_v23 = vld [vmem:[#allocation8 + $0x38c] ss:$16 sps:$4 sm:$0xff]  }
 0x16d   :  { %v4051_v26 = vld [vmem:[#allocation8 + $0x16c] ss:$16 sps:$4 sm:$0xff]  }
 0x16e   :  { %2411 = vmatpush2.bf16.msra.mxu0 %v3947_v55  ;;  %2454 = vmatpush2.bf16.msra.mxu1 %v3950_v56  ;;  %v4010_v55 = vld [vmem:[#allocation8 + $0x248] ss:$16 sps:$4 sm:$0xff]   ;;  %v4015_v56 = vld [vmem:[#allocation8 + $0x2c] ss:$16 sps:$4 sm:$0xff]  }
 0x16f   :  { %2412 = vmatprep.subr.bf16.mxu0 %v3955_v57  ;;  %2455 = vmatprep.subr.bf16.mxu1 %v3958_v58  ;;  %v4018_v57 = vld [vmem:[#allocation8 + $0x22c] ss:$16 sps:$4 sm:$0xff]   ;;  %v4013_v58 = vld [vmem:[#allocation8 + $0x28] ss:$16 sps:$4 sm:$0xff]  }
 0x170   :  { %v4054_v27 = vld [vmem:[#allocation8 + $0x36c] ss:$16 sps:$4 sm:$0xff]  }
 0x171   :  { %v4057_v29 = vld [vmem:[#allocation8 + $0x14c] ss:$16 sps:$4 sm:$0xff]  }
 0x172   :  { %2413 = vmatpush2.bf16.msra.mxu0 %v3953_v59  ;;  %2456 = vmatpush2.bf16.msra.mxu1 %v3956_v61  ;;  %v4016_v59 = vld [vmem:[#allocation8 + $0x228] ss:$16 sps:$4 sm:$0xff]   ;;  %v4024_v61 = vld [vmem:[#allocation8 + $0x20c] ss:$16 sps:$4 sm:$0xff]  }
 0x173   :  { %2414 = vmatprep.subr.bf16.mxu0 %v3961_v62  ;;  %2457 = vmatprep.subr.bf16.mxu1 %v3964_v1  ;;  %v4019_v62 = vld [vmem:[#allocation8 + $0x8] ss:$16 sps:$4 sm:$0xff]   ;;  %v4027_v1 = vld [vmem:[#allocation8 + $0x1ec] ss:$16 sps:$4 sm:$0xff]  }
 0x174   :  { %v4060_v22 = vld [vmem:[#allocation8 + $0x34c] ss:$16 sps:$4 sm:$0xff]  }
 0x176   :  { %2415 = vmatpush2.bf16.msra.mxu0 %v3959_v2  ;;  %2458 = vmatpush2.bf16.msra.mxu1 %v3962_v4  ;;  %v4030_v2 = vld [vmem:[#allocation8 + $0x3ec] ss:$16 sps:$4 sm:$0xff]   ;;  %v4028_v4 = vld [vmem:[#allocation8 + $0x3e8] ss:$16 sps:$4 sm:$0xff]  }
 0x177   :  { %2416 = vmatprep.subr.bf16.mxu0 %v3967_v5  ;;  %2459 = vmatprep.subr.bf16.mxu1 %v3970_v15  ;;  %v4033_v5 = vld [vmem:[#allocation8 + $0x1cc] ss:$16 sps:$4 sm:$0xff]   ;;  %v4031_v15 = vld [vmem:[#allocation8 + $0x1c8] ss:$16 sps:$4 sm:$0xff]  }
 0x17a   :  { %2417 = vmatpush2.bf16.msra.mxu0 %v3965_v17  ;;  %2460 = vmatpush2.bf16.msra.mxu1 %v3968_v20  ;;  %v4034_v17 = vld [vmem:[#allocation8 + $0x3c8] ss:$16 sps:$4 sm:$0xff]  }
 0x17b   :  { %2418 = vmatprep.subr.bf16.mxu0 %v3973_v21  ;;  %2461 = vmatprep.subr.bf16.mxu1 %v3976_v24  ;;  %v4037_v20 = vld [vmem:[#allocation8 + $0x1a8] ss:$16 sps:$4 sm:$0xff]  }
 0x17c   :  { %v4040_v21 = vld [vmem:[#allocation8 + $0x3a8] ss:$16 sps:$4 sm:$0xff]  }
 0x17d   :  { %v4043_v24 = vld [vmem:[#allocation8 + $0x188] ss:$16 sps:$4 sm:$0xff]  }
 0x17e   :  { %2419 = vmatpush2.bf16.msra.mxu0 %v3971_v11  ;;  %2462 = vmatpush2.bf16.msra.mxu1 %v3974_v28  ;;  %v4046_v11 = vld [vmem:[#allocation8 + $0x388] ss:$16 sps:$4 sm:$0xff]  }
 0x17f   :  { %2474 = vmatprep.subr.bf16.mxu0 %v3979_v13  ;;  %2517 = vmatprep.subr.bf16.mxu1 %v3982_v30  ;;  %v4049_v28 = vld [vmem:[#allocation8 + $0x168] ss:$16 sps:$4 sm:$0xff]  }
 0x180   :  { %v4052_v13 = vld [vmem:[#allocation8 + $0x368] ss:$16 sps:$4 sm:$0xff]  }
 0x181   :  { %2421 = vmatmul.mubr.bf16.vlgmr.msra.gmra.mxu0 %v4594_v32  ;;  %2464 = vmatmul.mubr.bf16.vlgmr.msra.gmra.mxu1 %v4596_v25  ;;  %v4055_v30 = vld [vmem:[#allocation8 + $0x148] ss:$16 sps:$4 sm:$0xff]  }
 0x182   :  { %2475 = vmatpush1.bf16.msra.mxu0 %v3977_v31  ;;  %2506 = vmatprep.mubr.bf16.mxu0 %v4556_v40  ;;  %v3998_v40 = vld [vmem:[#allocation8 + $0x288] ss:$16 sps:$4 sm:$0xff]  }
 0x183   :  { %2518 = vmatpush1.bf16.msra.mxu1 %v3980_v16  ;;  %2549 = vmatprep.mubr.bf16.mxu1 %v4560_v42  ;;  %v4001_v42 = vld [vmem:[#allocation8 + $0x68] ss:$16 sps:$4 sm:$0xff]   ;;  %v4063_v16 = vld [vmem:[#allocation8 + $0x12c] ss:$16 sps:$4 sm:$0xff]  }
 0x184   :  { %2476 = vmatprep.subr.bf16.mxu0 %v3985_v33  ;;  %2519 = vmatprep.subr.bf16.mxu1 %v3988_v34  ;;  %v4058_v31 = vld [vmem:[#allocation8 + $0x348] ss:$16 sps:$4 sm:$0xff]   ;;  %v4066_v33 = vld [vmem:[#allocation8 + $0x32c] ss:$16 sps:$4 sm:$0xff]  }
 0x185   :  { %v4061_v34 = vld [vmem:[#allocation8 + $0x128] ss:$16 sps:$4 sm:$0xff]  }
 0x186   :  { %2477 = vmatpush1.bf16.msra.mxu0 %v3983_v35  ;;  %v4064_v35 = vld [vmem:[#allocation8 + $0x328] ss:$16 sps:$4 sm:$0xff]  }
 0x187   :  { %2520 = vmatpush1.bf16.msra.mxu1 %v3986_v36  ;;  %2478 = vmatprep.subr.bf16.mxu0 %v3991_v37  ;;  %v4069_v36 = vld [vmem:[#allocation8 + $0x10c] ss:$16 sps:$4 sm:$0xff]  }
 0x188   :  { %2521 = vmatprep.subr.bf16.mxu1 %v3994_v38  ;;  %v4072_v37 = vld [vmem:[#allocation8 + $0x30c] ss:$16 sps:$4 sm:$0xff]   ;;  %v4067_v38 = vld [vmem:[#allocation8 + $0x108] ss:$16 sps:$4 sm:$0xff]  }
 0x18a   :  { %2479 = vmatpush1.bf16.msra.mxu0 %v3989_v0  ;;  %v4070_v0 = vld [vmem:[#allocation8 + $0x308] ss:$16 sps:$4 sm:$0xff]  }
 0x18b   :  { %2522 = vmatpush1.bf16.msra.mxu1 %v3992_v43  ;;  %2480 = vmatprep.subr.bf16.mxu0 %v3997_v46  ;;  %v4075_v43 = vld [vmem:[#allocation8 + $0x4ec] ss:$16 sps:$4 sm:$0xff]  }
 0x18c   :  { %2523 = vmatprep.subr.bf16.mxu1 %v4000_v47  ;;  %v4078_v46 = vld [vmem:[#allocation8 + $0x6ec] ss:$16 sps:$4 sm:$0xff]   ;;  %v4073_v47 = vld [vmem:[#allocation8 + $0x4e8] ss:$16 sps:$4 sm:$0xff]  }
 0x18e   :  { %2481 = vmatpush1.bf16.msra.mxu0 %v3995_v48  ;;  %v4076_v48 = vld [vmem:[#allocation8 + $0x6e8] ss:$16 sps:$4 sm:$0xff]  }
 0x18f   :  { %2524 = vmatpush1.bf16.msra.mxu1 %v3998_v40  ;;  %2482 = vmatprep.subr.bf16.mxu0 %v4003_v49  ;;  %v4081_v40 = vld [vmem:[#allocation8 + $0x4cc] ss:$16 sps:$4 sm:$0xff]  }
 0x190   :  { %2525 = vmatprep.subr.bf16.mxu1 %v4006_v50  ;;  %v4084_v49 = vld [vmem:[#allocation8 + $0x6cc] ss:$16 sps:$4 sm:$0xff]   ;;  %v4079_v50 = vld [vmem:[#allocation8 + $0x4c8] ss:$16 sps:$4 sm:$0xff]  }
 0x192   :  { %2483 = vmatpush1.bf16.msra.mxu0 %v4001_v42  ;;  %v4082_v42 = vld [vmem:[#allocation8 + $0x6c8] ss:$16 sps:$4 sm:$0xff]  }
 0x193   :  { %2526 = vmatpush1.bf16.msra.mxu1 %v4004_v51  ;;  %2484 = vmatprep.subr.bf16.mxu0 %v4009_v52  ;;  %v4087_v51 = vld [vmem:[#allocation8 + $0x4ac] ss:$16 sps:$4 sm:$0xff]  }
 0x194   :  { %2527 = vmatprep.subr.bf16.mxu1 %v4012_v53  ;;  %v4090_v52 = vld [vmem:[#allocation8 + $0x6ac] ss:$16 sps:$4 sm:$0xff]   ;;  %v4085_v53 = vld [vmem:[#allocation8 + $0x4a8] ss:$16 sps:$4 sm:$0xff]  }
 0x196   :  { %2485 = vmatpush1.bf16.msra.mxu0 %v4007_v54  ;;  %v4093_v54 = vld [vmem:[#allocation8 + $0x48c] ss:$16 sps:$4 sm:$0xff]  }
 0x197   :  { %2528 = vmatpush1.bf16.msra.mxu1 %v4010_v55  ;;  %2486 = vmatprep.subr.bf16.mxu0 %v4015_v56  ;;  %v4091_v55 = vld [vmem:[#allocation8 + $0x488] ss:$16 sps:$4 sm:$0xff]   ;;  %v4099_v56 = vld [vmem:[#allocation8 + $0x46c] ss:$16 sps:$4 sm:$0xff]  }
 0x198   :  { %2529 = vmatprep.subr.bf16.mxu1 %v4018_v57  ;;  %v4102_v57 = vld [vmem:[#allocation8 + $0x66c] ss:$16 sps:$4 sm:$0xff]  }
 0x19a   :  { %2487 = vmatpush1.bf16.msra.mxu0 %v4013_v58  ;;  %v4100_v58 = vld [vmem:[#allocation8 + $0x668] ss:$16 sps:$4 sm:$0xff]  }
 0x19b   :  { %2530 = vmatpush1.bf16.msra.mxu1 %v4016_v59  ;;  %2488 = vmatprep.subr.bf16.mxu0 %v4021_v60  ;;  %v4105_v59 = vld [vmem:[#allocation8 + $0x44c] ss:$16 sps:$4 sm:$0xff]  }
 0x19c   :  { %2531 = vmatprep.subr.bf16.mxu1 %v4024_v61  ;;  %v4108_v60 = vld [vmem:[#allocation8 + $0x64c] ss:$16 sps:$4 sm:$0xff]   ;;  %v4103_v61 = vld [vmem:[#allocation8 + $0x448] ss:$16 sps:$4 sm:$0xff]  }
 0x19e   :  { %2489 = vmatpush1.bf16.msra.mxu0 %v4019_v62  ;;  %v4106_v62 = vld [vmem:[#allocation8 + $0x648] ss:$16 sps:$4 sm:$0xff]  }
 0x19f   :  { %2532 = vmatpush1.bf16.msra.mxu1 %v4022_v63  ;;  %2490 = vmatprep.subr.bf16.mxu0 %v4027_v1  ;;  %v4111_v63 = vld [vmem:[#allocation8 + $0x42c] ss:$16 sps:$4 sm:$0xff]  }
 0x1a0   :  { %2533 = vmatprep.subr.bf16.mxu1 %v4030_v2  ;;  %v4114_v1 = vld [vmem:[#allocation8 + $0x62c] ss:$16 sps:$4 sm:$0xff]   ;;  %v4109_v2 = vld [vmem:[#allocation8 + $0x428] ss:$16 sps:$4 sm:$0xff]  }
 0x1a2   :  { %2491 = vmatpush2.bf16.msra.mxu0 %v4025_v3  ;;  %v4112_v3 = vld [vmem:[#allocation8 + $0x628] ss:$16 sps:$4 sm:$0xff]  }
 0x1a3   :  { %2534 = vmatpush2.bf16.msra.mxu1 %v4028_v4  ;;  %2492 = vmatprep.subr.bf16.mxu0 %v4033_v5  ;;  %v4117_v4 = vld [vmem:[#allocation8 + $0x40c] ss:$16 sps:$4 sm:$0xff]  }
 0x1a4   :  { %2535 = vmatprep.subr.bf16.mxu1 %v4036_v14  ;;  %v4120_v5 = vld [vmem:[#allocation8 + $0x60c] ss:$16 sps:$4 sm:$0xff]   ;;  %v4115_v14 = vld [vmem:[#allocation8 + $0x408] ss:$16 sps:$4 sm:$0xff]  }
 0x1a6   :  { %2493 = vmatpush2.bf16.msra.mxu0 %v4031_v15  ;;  %v4118_v15 = vld [vmem:[#allocation8 + $0x608] ss:$16 sps:$4 sm:$0xff]  }
 0x1a7   :  { %2536 = vmatpush2.bf16.msra.mxu1 %v4034_v17  ;;  %2494 = vmatprep.subr.bf16.mxu0 %v4039_v18  ;;  %v4123_v17 = vld [vmem:[#allocation8 + $0x5ec] ss:$16 sps:$4 sm:$0xff]  }
 0x1a8   :  { %2537 = vmatprep.subr.bf16.mxu1 %v4042_v19  ;;  %v4126_v18 = vld [vmem:[#allocation8 + $0x7ec] ss:$16 sps:$4 sm:$0xff]   ;;  %v4121_v19 = vld [vmem:[#allocation8 + $0x5e8] ss:$16 sps:$4 sm:$0xff]  }
 0x1aa   :  { %2495 = vmatpush2.bf16.msra.mxu0 %v4037_v20  ;;  %v4124_v20 = vld [vmem:[#allocation8 + $0x7e8] ss:$16 sps:$4 sm:$0xff]  }
 0x1ab   :  { %2538 = vmatpush2.bf16.msra.mxu1 %v4040_v21  ;;  %2496 = vmatprep.subr.bf16.mxu0 %v4045_v6  ;;  %v4129_v21 = vld [vmem:[#allocation8 + $0x5cc] ss:$16 sps:$4 sm:$0xff]  }
 0x1ac   :  { %2539 = vmatprep.subr.bf16.mxu1 %v4048_v23  ;;  %v4132_v6 = vld [vmem:[#allocation8 + $0x7cc] ss:$16 sps:$4 sm:$0xff]   ;;  %v4127_v23 = vld [vmem:[#allocation8 + $0x5c8] ss:$16 sps:$4 sm:$0xff]  }
 0x1ae   :  { %2497 = vmatpush2.bf16.msra.mxu0 %v4043_v24  ;;  %v4130_v24 = vld [vmem:[#allocation8 + $0x7c8] ss:$16 sps:$4 sm:$0xff]  }
 0x1af   :  { %2540 = vmatpush2.bf16.msra.mxu1 %v4046_v11  ;;  %2498 = vmatprep.subr.bf16.mxu0 %v4051_v26  ;;  %v4135_v11 = vld [vmem:[#allocation8 + $0x5ac] ss:$16 sps:$4 sm:$0xff]  }
 0x1b0   :  { %2541 = vmatprep.subr.bf16.mxu1 %v4054_v27  ;;  %v4138_v26 = vld [vmem:[#allocation8 + $0x7ac] ss:$16 sps:$4 sm:$0xff]   ;;  %v4133_v27 = vld [vmem:[#allocation8 + $0x5a8] ss:$16 sps:$4 sm:$0xff]  }
 0x1b2   :  { %2499 = vmatpush2.bf16.msra.mxu0 %v4049_v28  ;;  %v4136_v28 = vld [vmem:[#allocation8 + $0x7a8] ss:$16 sps:$4 sm:$0xff]  }
 0x1b3   :  { %2542 = vmatpush2.bf16.msra.mxu1 %v4052_v13  ;;  %2500 = vmatprep.subr.bf16.mxu0 %v4057_v29  ;;  %v4141_v13 = vld [vmem:[#allocation8 + $0x58c] ss:$16 sps:$4 sm:$0xff]  }
 0x1b4   :  { %2543 = vmatprep.subr.bf16.mxu1 %v4060_v22  ;;  %v4144_v29 = vld [vmem:[#allocation8 + $0x78c] ss:$16 sps:$4 sm:$0xff]   ;;  %v4139_v22 = vld [vmem:[#allocation8 + $0x588] ss:$16 sps:$4 sm:$0xff]  }
 0x1b6   :  { %2501 = vmatpush2.bf16.msra.mxu0 %v4055_v30  ;;  %v4142_v30 = vld [vmem:[#allocation8 + $0x788] ss:$16 sps:$4 sm:$0xff]  }
 0x1b7   :  { %2544 = vmatpush2.bf16.msra.mxu1 %v4058_v31  ;;  %2502 = vmatprep.subr.bf16.mxu0 %v4063_v16  ;;  %v4147_v31 = vld [vmem:[#allocation8 + $0x56c] ss:$16 sps:$4 sm:$0xff]  }
 0x1b8   :  { %2545 = vmatprep.subr.bf16.mxu1 %v4066_v33  ;;  %v4150_v16 = vld [vmem:[#allocation8 + $0x76c] ss:$16 sps:$4 sm:$0xff]   ;;  %v4145_v33 = vld [vmem:[#allocation8 + $0x568] ss:$16 sps:$4 sm:$0xff]  }
 0x1ba   :  { %2503 = vmatpush2.bf16.msra.mxu0 %v4061_v34  ;;  %v4148_v34 = vld [vmem:[#allocation8 + $0x768] ss:$16 sps:$4 sm:$0xff]  }
 0x1bb   :  { %2546 = vmatpush2.bf16.msra.mxu1 %v4064_v35  ;;  %2504 = vmatprep.subr.bf16.mxu0 %v4069_v36  ;;  %v4153_v35 = vld [vmem:[#allocation8 + $0x54c] ss:$16 sps:$4 sm:$0xff]  }
 0x1bc   :  { %2547 = vmatprep.subr.bf16.mxu1 %v4072_v37  ;;  %v4156_v36 = vld [vmem:[#allocation8 + $0x74c] ss:$16 sps:$4 sm:$0xff]   ;;  %v4151_v37 = vld [vmem:[#allocation8 + $0x548] ss:$16 sps:$4 sm:$0xff]  }
 0x1be   :  { %2505 = vmatpush2.bf16.msra.mxu0 %v4067_v38  ;;  %v4154_v38 = vld [vmem:[#allocation8 + $0x748] ss:$16 sps:$4 sm:$0xff]  }
 0x1bf   :  { %2548 = vmatpush2.bf16.msra.mxu1 %v4070_v0  ;;  %2560 = vmatprep.subr.bf16.mxu0 %v4075_v43  ;;  %v4159_v0 = vld [vmem:[#allocation8 + $0x52c] ss:$16 sps:$4 sm:$0xff]  }
 0x1c0   :  { %2603 = vmatprep.subr.bf16.mxu1 %v4078_v46  ;;  %v4162_v43 = vld [vmem:[#allocation8 + $0x72c] ss:$16 sps:$4 sm:$0xff]   ;;  %v4157_v46 = vld [vmem:[#allocation8 + $0x528] ss:$16 sps:$4 sm:$0xff]  }
 0x1c1   :  { %2507 = vmatmul.mubr.bf16.vlgmr.msra.gmra.mxu0 %v4558_v41  ;;  %v4088_v41 = vld [vmem:[#allocation8 + $0x6a8] ss:$16 sps:$4 sm:$0xff]  }
 0x1c2   :  { %2550 = vmatmul.mubr.bf16.vlgmr.msra.gmra.mxu1 %v4562_v45  ;;  %2561 = vmatpush1.bf16.msra.mxu0 %v4073_v47  ;;  %v4096_v45 = vld [vmem:[#allocation8 + $0x68c] ss:$16 sps:$4 sm:$0xff]   ;;  %v4160_v47 = vld [vmem:[#allocation8 + $0x728] ss:$16 sps:$4 sm:$0xff]  }
 0x1c3   :  { %2592 = vmatprep.mubr.bf16.mxu0 %v4580_v39  ;;  %2604 = vmatpush1.bf16.msra.mxu1 %v4076_v48  ;;  %v4094_v39 = vld [vmem:[#allocation8 + $0x688] ss:$16 sps:$4 sm:$0xff]   ;;  %v4165_v48 = vld [vmem:[#allocation8 + $0x50c] ss:$16 sps:$4 sm:$0xff]  }
 0x1c4   :  { %2635 = vmatprep.mubr.bf16.mxu1 %v4582_v44  ;;  %2562 = vmatprep.subr.bf16.mxu0 %v4081_v40  ;;  %v4097_v44 = vld [vmem:[#allocation8 + $0x468] ss:$16 sps:$4 sm:$0xff]   ;;  %v4168_v40 = vld [vmem:[#allocation8 + $0x70c] ss:$16 sps:$4 sm:$0xff]  }
 0x1c5   :  { %2605 = vmatprep.subr.bf16.mxu1 %v4084_v49  ;;  %v4163_v49 = vld [vmem:[#allocation8 + $0x508] ss:$16 sps:$4 sm:$0xff]  }
 0x1c6   :  { %2563 = vmatpush1.bf16.msra.mxu0 %v4079_v50  ;;  %v4166_v50 = vld [vmem:[#allocation8 + $0x708] ss:$16 sps:$4 sm:$0xff]  }
 0x1c7   :  { %2606 = vmatpush1.bf16.msra.mxu1 %v4082_v42  ;;  %2564 = vmatprep.subr.bf16.mxu0 %v4087_v51  ;;  %v4171_v42 = vld [vmem:[#allocation10 + $0x74] ss:$8 sps:$4 sm:$0xff]   ;;  %v4169_v51 = vld [vmem:[#allocation10 + $0x70] ss:$8 sps:$4 sm:$0xff]  }
 0x1c8   :  { %2607 = vmatprep.subr.bf16.mxu1 %v4090_v52  ;;  %v4174_v52 = vld [vmem:[#allocation10 + $0x64] ss:$8 sps:$4 sm:$0xff]  }
 0x1ca   :  { %2565 = vmatpush1.bf16.msra.mxu0 %v4085_v53  ;;  %v4172_v53 = vld [vmem:[#allocation10 + $0x60] ss:$8 sps:$4 sm:$0xff]  }
 0x1cb   :  { %2608 = vmatpush1.bf16.msra.mxu1 %v4088_v41  ;;  %2566 = vmatprep.subr.bf16.mxu0 %v4093_v54  ;;  %v4177_v41 = vld [vmem:[#allocation10 + $0x54] ss:$8 sps:$4 sm:$0xff]   ;;  %v4175_v54 = vld [vmem:[#allocation10 + $0x50] ss:$8 sps:$4 sm:$0xff]  }
 0x1cc   :  { %2609 = vmatprep.subr.bf16.mxu1 %v4096_v45  ;;  %v4180_v45 = vld [vmem:[#allocation10 + $0x44] ss:$8 sps:$4 sm:$0xff]  }
 0x1ce   :  { %2567 = vmatpush1.bf16.msra.mxu0 %v4091_v55  ;;  %v4178_v55 = vld [vmem:[#allocation10 + $0x40] ss:$8 sps:$4 sm:$0xff]  }
 0x1cf   :  { %2610 = vmatpush1.bf16.msra.mxu1 %v4094_v39  ;;  %2568 = vmatprep.subr.bf16.mxu0 %v4099_v56  ;;  %v4217_v39 = vld [vmem:[#allocation10 + $0x170] ss:$8 sps:$4 sm:$0xff]   ;;  %v4219_v56 = vld [vmem:[#allocation10 + $0x174] ss:$8 sps:$4 sm:$0xff]  }
 0x1d0   :  { %2611 = vmatprep.subr.bf16.mxu1 %v4102_v57  ;;  %v4183_v57 = vld [vmem:[#allocation10 + $0x34] ss:$8 sps:$4 sm:$0xff]  }
 0x1d2   :  { %2569 = vmatpush1.bf16.msra.mxu0 %v4097_v44  ;;  %v4222_v44 = vld [vmem:[#allocation10 + $0x164] ss:$8 sps:$4 sm:$0xff]  }
 0x1d3   :  { %2612 = vmatpush1.bf16.msra.mxu1 %v4100_v58  ;;  %2570 = vmatprep.subr.bf16.mxu0 %v4105_v59  ;;  %v4225_v58 = vld [vmem:[#allocation10 + $0x154] ss:$8 sps:$4 sm:$0xff]   ;;  %v4186_v59 = vld [vmem:[#allocation10 + $0x24] ss:$8 sps:$4 sm:$0xff]  }
 0x1d4   :  { %2613 = vmatprep.subr.bf16.mxu1 %v4108_v60  ;;  %v4223_v60 = vld [vmem:[#allocation10 + $0x150] ss:$8 sps:$4 sm:$0xff]  }
 0x1d6   :  { %2571 = vmatpush1.bf16.msra.mxu0 %v4103_v61  ;;  %v4184_v61 = vld [vmem:[#allocation10 + $0x20] ss:$8 sps:$4 sm:$0xff]  }
 0x1d7   :  { %2614 = vmatpush1.bf16.msra.mxu1 %v4106_v62  ;;  %2572 = vmatprep.subr.bf16.mxu0 %v4111_v63  ;;  %v4228_v62 = vld [vmem:[#allocation10 + $0x144] ss:$8 sps:$4 sm:$0xff]   ;;  %v4189_v63 = vld [vmem:[#allocation10 + $0x14] ss:$8 sps:$4 sm:$0xff]  }
 0x1d8   :  { %2615 = vmatprep.subr.bf16.mxu1 %v4114_v1  ;;  %v4226_v1 = vld [vmem:[#allocation10 + $0x140] ss:$8 sps:$4 sm:$0xff]  }
 0x1da   :  { %2573 = vmatpush1.bf16.msra.mxu0 %v4109_v2  ;;  %v4187_v2 = vld [vmem:[#allocation10 + $0x10] ss:$8 sps:$4 sm:$0xff]  }
 0x1db   :  { %2616 = vmatpush1.bf16.msra.mxu1 %v4112_v3  ;;  %2574 = vmatprep.subr.bf16.mxu0 %v4117_v4  ;;  %v4231_v3 = vld [vmem:[#allocation10 + $0x134] ss:$8 sps:$4 sm:$0xff]   ;;  %v4192_v4 = vld [vmem:[#allocation10 + $0x4] ss:$8 sps:$4 sm:$0xff]  }
 0x1dc   :  { %2617 = vmatprep.subr.bf16.mxu1 %v4120_v5  ;;  %v4229_v5 = vld [vmem:[#allocation10 + $0x130] ss:$8 sps:$4 sm:$0xff]  }
 0x1de   :  { %2575 = vmatpush1.bf16.msra.mxu0 %v4115_v14  ;;  %v4190_v14 = vld [vmem:[#allocation10] ss:$8 sps:$4 sm:$0xff]  }
 0x1df   :  { %2618 = vmatpush1.bf16.msra.mxu1 %v4118_v15  ;;  %2576 = vmatprep.subr.bf16.mxu0 %v4123_v17  ;;  %v4234_v15 = vld [vmem:[#allocation10 + $0x124] ss:$8 sps:$4 sm:$0xff]   ;;  %v4195_v17 = vld [vmem:[#allocation10 + $0xf4] ss:$8 sps:$4 sm:$0xff]  }
 0x1e0   :  { %2619 = vmatprep.subr.bf16.mxu1 %v4126_v18  ;;  %v4232_v18 = vld [vmem:[#allocation10 + $0x120] ss:$8 sps:$4 sm:$0xff]  }
 0x1e2   :  { %2577 = vmatpush2.bf16.msra.mxu0 %v4121_v19  ;;  %v4193_v19 = vld [vmem:[#allocation10 + $0xf0] ss:$8 sps:$4 sm:$0xff]  }
 0x1e3   :  { %2620 = vmatpush2.bf16.msra.mxu1 %v4124_v20  ;;  %2578 = vmatprep.subr.bf16.mxu0 %v4129_v21  ;;  %v4237_v20 = vld [vmem:[#allocation10 + $0x114] ss:$8 sps:$4 sm:$0xff]   ;;  %v4198_v21 = vld [vmem:[#allocation10 + $0xe4] ss:$8 sps:$4 sm:$0xff]  }
 0x1e4   :  { %2621 = vmatprep.subr.bf16.mxu1 %v4132_v6  ;;  %v4235_v6 = vld [vmem:[#allocation10 + $0x110] ss:$8 sps:$4 sm:$0xff]  }
 0x1e6   :  { %2579 = vmatpush2.bf16.msra.mxu0 %v4127_v23  ;;  %v4196_v23 = vld [vmem:[#allocation10 + $0xe0] ss:$8 sps:$4 sm:$0xff]  }
 0x1e7   :  { %2622 = vmatpush2.bf16.msra.mxu1 %v4130_v24  ;;  %2580 = vmatprep.subr.bf16.mxu0 %v4135_v11  ;;  %v4240_v24 = vld [vmem:[#allocation10 + $0x104] ss:$8 sps:$4 sm:$0xff]   ;;  %v4201_v11 = vld [vmem:[#allocation10 + $0xd4] ss:$8 sps:$4 sm:$0xff]  }
 0x1e8   :  { %2623 = vmatprep.subr.bf16.mxu1 %v4138_v26  ;;  %v4238_v26 = vld [vmem:[#allocation10 + $0x100] ss:$8 sps:$4 sm:$0xff]  }
 0x1ea   :  { %2581 = vmatpush2.bf16.msra.mxu0 %v4133_v27  ;;  %v4199_v27 = vld [vmem:[#allocation10 + $0xd0] ss:$8 sps:$4 sm:$0xff]  }
 0x1eb   :  { %2624 = vmatpush2.bf16.msra.mxu1 %v4136_v28  ;;  %2582 = vmatprep.subr.bf16.mxu0 %v4141_v13  ;;  %v4243_v28 = vld [vmem:[#allocation10 + $0x1f4] ss:$8 sps:$4 sm:$0xff]   ;;  %v4204_v13 = vld [vmem:[#allocation10 + $0xc4] ss:$8 sps:$4 sm:$0xff]  }
 0x1ec   :  { %2625 = vmatprep.subr.bf16.mxu1 %v4144_v29  ;;  %v4241_v29 = vld [vmem:[#allocation10 + $0x1f0] ss:$8 sps:$4 sm:$0xff]  }
 0x1ee   :  { %2583 = vmatpush2.bf16.msra.mxu0 %v4139_v22  ;;  %v4202_v22 = vld [vmem:[#allocation10 + $0xc0] ss:$8 sps:$4 sm:$0xff]  }
 0x1ef   :  { %2626 = vmatpush2.bf16.msra.mxu1 %v4142_v30  ;;  %2584 = vmatprep.subr.bf16.mxu0 %v4147_v31  ;;  %v4246_v30 = vld [vmem:[#allocation10 + $0x1e4] ss:$8 sps:$4 sm:$0xff]   ;;  %v4207_v31 = vld [vmem:[#allocation10 + $0xb4] ss:$8 sps:$4 sm:$0xff]  }
 0x1f0   :  { %2627 = vmatprep.subr.bf16.mxu1 %v4150_v16  ;;  %v4244_v16 = vld [vmem:[#allocation10 + $0x1e0] ss:$8 sps:$4 sm:$0xff]  }
 0x1f2   :  { %2585 = vmatpush2.bf16.msra.mxu0 %v4145_v33  ;;  %v4205_v33 = vld [vmem:[#allocation10 + $0xb0] ss:$8 sps:$4 sm:$0xff]  }
 0x1f3   :  { %2628 = vmatpush2.bf16.msra.mxu1 %v4148_v34  ;;  %2586 = vmatprep.subr.bf16.mxu0 %v4153_v35  ;;  %v4249_v34 = vld [vmem:[#allocation10 + $0x1d4] ss:$8 sps:$4 sm:$0xff]   ;;  %v4210_v35 = vld [vmem:[#allocation10 + $0xa4] ss:$8 sps:$4 sm:$0xff]  }
 0x1f4   :  { %2629 = vmatprep.subr.bf16.mxu1 %v4156_v36  ;;  %v4247_v36 = vld [vmem:[#allocation10 + $0x1d0] ss:$8 sps:$4 sm:$0xff]  }
 0x1f6   :  { %2587 = vmatpush2.bf16.msra.mxu0 %v4151_v37  ;;  %v4208_v37 = vld [vmem:[#allocation10 + $0xa0] ss:$8 sps:$4 sm:$0xff]  }
 0x1f7   :  { %2630 = vmatpush2.bf16.msra.mxu1 %v4154_v38  ;;  %2588 = vmatprep.subr.bf16.mxu0 %v4159_v0  ;;  %v4252_v38 = vld [vmem:[#allocation10 + $0x1c4] ss:$8 sps:$4 sm:$0xff]  }
 0x1f8   :  { %2631 = vmatprep.subr.bf16.mxu1 %v4162_v43  ;;  %v4213_v43 = vld [vmem:[#allocation10 + $0x94] ss:$8 sps:$4 sm:$0xff]  }
 0x1fa   :  { %2589 = vmatpush2.bf16.msra.mxu0 %v4157_v46 }
 0x1fb   :  { %2632 = vmatpush2.bf16.msra.mxu1 %v4160_v47  ;;  %2590 = vmatprep.subr.bf16.mxu0 %v4165_v48  ;;  %v4250_v47 = vld [vmem:[#allocation10 + $0x1c0] ss:$8 sps:$4 sm:$0xff]   ;;  %v4211_v48 = vld [vmem:[#allocation10 + $0x90] ss:$8 sps:$4 sm:$0xff]  }
 0x1fc   :  { %2633 = vmatprep.subr.bf16.mxu1 %v4168_v40 }
 0x1fe   :  { %2591 = vmatpush2.bf16.msra.mxu0 %v4163_v49  ;;  %v4216_v49 = vld [vmem:[#allocation10 + $0x84] ss:$8 sps:$4 sm:$0xff]  }
 0x1ff   :  { %2634 = vmatpush2.bf16.msra.mxu1 %v4166_v50  ;;  %3054 = vmatprep.subr.bf16.mxu0 %v4171_v42  ;;  %v4611_v50 = vld [vmem:[%s4641_s4] sm:$0xf] }
 0x200   :  { %3097 = vmatprep.subr.bf16.mxu1 %v4219_v56 }
 0x201   :  { %2593 = vmatmul.mubr.bf16.vlgmr.msra.gmra.mxu0 %v4594_v32  ;;  %v4220_v32 = vld [vmem:[#allocation10 + $0x160] ss:$8 sps:$4 sm:$0xff]   ;;  %v2336_v0 = vpop.f32.mrf.mxu0  ;;  %v2379_v46 = vpop.f32.mrf.mxu1 }
 0x202   :  { %2636 = vmatmul.mubr.bf16.vlgmr.msra.gmra.mxu1 %v4596_v25  ;;  %3055 = vmatpush1.bf16.msra.mxu0 %v4169_v51  ;;  %v4181_v25 = vld [vmem:[#allocation10 + $0x30] ss:$8 sps:$4 sm:$0xff]   ;;  %v1009_v51 = vrot.slane %v4611_v50, %v4537_v8 }
 0x203   :  { %3056 = vmatprep.subr.bf16.mxu0 %v4174_v52  ;;  %3098 = vmatpush1.bf16.msra.mxu1 %v4217_v39  ;;  %v2338_v40 = vpop.f32.mrf.mxu0  ;;  %v2381_v42 = vpop.f32.mrf.mxu1  ;;  %v4214_v52 = vld [vmem:[#allocation10 + $0x80] ss:$8 sps:$4 sm:$0xff]  }
 0x204   :  { %3099 = vmatprep.subr.bf16.mxu1 %v4222_v44 }
 0x206   :  { %3057 = vmatpush1.bf16.msra.mxu0 %v4172_v53  ;;  %v1005_v53 = vrot.slane %v4611_v50, %v4540_v9 }
 0x207   :  { %3058 = vmatprep.subr.bf16.mxu0 %v4177_v41  ;;  %3100 = vmatpush1.bf16.msra.mxu1 %v4220_v32  ;;  %v2340_v41 = vpop.f32.mrf.mxu0  ;;  %v4255_v32 = vld [vmem:[#allocation10 + $0x1b4] ss:$8 sps:$4 sm:$0xff]  }
 0x208   :  { %3101 = vmatprep.subr.bf16.mxu1 %v4225_v58  ;;  %v2341_v56 = vadd.f32 %v2340_v41, %v1005_v53 }
 0x209   :  { %v2342_v39 = vpop.f32.mrf.mxu0 }
 0x20a   :  { %3059 = vmatpush1.bf16.msra.mxu0 %v4175_v54  ;;  %v2383_v54 = vpop.f32.mrf.mxu1  ;;  %v2343_v58 = vadd.f32 %v2342_v39, %v1009_v51 }
 0x20b   :  { %3060 = vmatprep.subr.bf16.mxu0 %v4180_v45  ;;  %3102 = vmatpush1.bf16.msra.mxu1 %v4223_v60  ;;  %v2339_v45 = vadd.f32 %v2338_v40, %v1009_v51  ;;  %v4253_v60 = vld [vmem:[#allocation10 + $0x1b0] ss:$8 sps:$4 sm:$0xff]  }
 0x20c   :  { %3103 = vmatprep.subr.bf16.mxu1 %v4228_v62 }
 0x20e   :  { %3061 = vmatpush1.bf16.msra.mxu0 %v4178_v55  ;;  %v2337_v55 = vadd.f32 %v2336_v0, %v1005_v53  ;;  %v4270_v0 = vld [vmem:[#allocation11 + $0x28] sm:$0xff]   ;;  %v1013_v53 = vrot.slane %v4611_v50, %v192_v12 }
 0x20f   :  { %3062 = vmatprep.subr.bf16.mxu0 %v4183_v57  ;;  %3104 = vmatpush1.bf16.msra.mxu1 %v4226_v1  ;;  %v2385_v57 = vpop.f32.mrf.mxu1 }
 0x210   :  { %3105 = vmatprep.subr.bf16.mxu1 %v4231_v3 }
 0x212   :  { %3063 = vmatpush1.bf16.msra.mxu0 %v4181_v25  ;;  %v2382_v25 = vadd.f32 %v2381_v42, %v2339_v45 }
 0x213   :  { %3064 = vmatprep.subr.bf16.mxu0 %v4186_v59  ;;  %3106 = vmatpush1.bf16.msra.mxu1 %v4229_v5  ;;  %v4258_v5 = vld [vmem:[#allocation10 + $0x1a4] ss:$8 sps:$4 sm:$0xff]  }
 0x214   :  { %3107 = vmatprep.subr.bf16.mxu1 %v4234_v15 }
 0x216   :  { %3065 = vmatpush1.bf16.msra.mxu0 %v4184_v61  ;;  %v2380_v61 = vadd.f32 %v2379_v46, %v2337_v55  ;;  %v4272_v46 = vld [vmem:[#allocation11 + $0x20] sm:$0xff]  }
 0x217   :  { %3066 = vmatprep.subr.bf16.mxu0 %v4189_v63  ;;  %3108 = vmatpush1.bf16.msra.mxu1 %v4232_v18  ;;  %v2384_v63 = vadd.f32 %v2383_v54, %v2341_v56  ;;  %v4256_v18 = vld [vmem:[#allocation10 + $0x1a0] ss:$8 sps:$4 sm:$0xff]  }
 0x218   :  { %3109 = vmatprep.subr.bf16.mxu1 %v4237_v20 }
 0x21a   :  { %3067 = vmatpush1.bf16.msra.mxu0 %v4187_v2 }
 0x21b   :  { %3068 = vmatprep.subr.bf16.mxu0 %v4192_v4  ;;  %3110 = vmatpush1.bf16.msra.mxu1 %v4235_v6 }
 0x21c   :  { %3111 = vmatprep.subr.bf16.mxu1 %v4240_v24 }
 0x21e   :  { %3069 = vmatpush1.bf16.msra.mxu0 %v4190_v14  ;;  %v2386_v14 = vadd.f32 %v2385_v57, %v2343_v58 }
 0x21f   :  { %3070 = vmatprep.subr.bf16.mxu0 %v4195_v17  ;;  %3112 = vmatpush1.bf16.msra.mxu1 %v4238_v26 }
 0x220   :  { %3113 = vmatprep.subr.bf16.mxu1 %v4243_v28 }
 0x222   :  { %3071 = vmatpush2.bf16.msra.mxu0 %v4193_v19 }
 0x223   :  { %3072 = vmatprep.subr.bf16.mxu0 %v4198_v21  ;;  %3114 = vmatpush2.bf16.msra.mxu1 %v4241_v29 }
 0x224   :  { %3115 = vmatprep.subr.bf16.mxu1 %v4246_v30  ;;  %v4264_v30 = vld [vmem:[#allocation10 + $0x184] ss:$8 sps:$4 sm:$0xff]  }
 0x226   :  { %3073 = vmatpush2.bf16.msra.mxu0 %v4196_v23 }
 0x227   :  { %3074 = vmatprep.subr.bf16.mxu0 %v4201_v11  ;;  %3116 = vmatpush2.bf16.msra.mxu1 %v4244_v16  ;;  %v4261_v11 = vld [vmem:[#allocation10 + $0x194] ss:$8 sps:$4 sm:$0xff]   ;;  %v4262_v16 = vld [vmem:[#allocation10 + $0x180] ss:$8 sps:$4 sm:$0xff]  }
 0x228   :  { %3117 = vmatprep.subr.bf16.mxu1 %v4249_v34  ;;  %v4265_v34 = vld [vmem:[#allocation11 + $0x78] sm:$0xff]  }
 0x22a   :  { %3075 = vmatpush2.bf16.msra.mxu0 %v4199_v27  ;;  %v4259_v27 = vld [vmem:[#allocation10 + $0x190] ss:$8 sps:$4 sm:$0xff]  }
 0x22b   :  { %3076 = vmatprep.subr.bf16.mxu0 %v4204_v13  ;;  %3118 = vmatpush2.bf16.msra.mxu1 %v4247_v36  ;;  %v4267_v36 = vld [vmem:[#allocation11 + $0x70] sm:$0xff]  }
 0x22c   :  { %3119 = vmatprep.subr.bf16.mxu1 %v4252_v38  ;;  %v4269_v38 = vld [vmem:[#allocation11 + $0x68] sm:$0xff]  }
 0x22e   :  { %3077 = vmatpush2.bf16.msra.mxu0 %v4202_v22 }
 0x22f   :  { %3078 = vmatprep.subr.bf16.mxu0 %v4207_v31  ;;  %3120 = vmatpush2.bf16.msra.mxu1 %v4250_v47  ;;  %v4273_v47 = vld [vmem:[#allocation11 + $0x58] sm:$0xff]  }
 0x230   :  { %3121 = vmatprep.subr.bf16.mxu1 %v4255_v32 }
 0x232   :  { %3079 = vmatpush2.bf16.msra.mxu0 %v4205_v33 }
 0x233   :  { %3080 = vmatprep.subr.bf16.mxu0 %v4210_v35  ;;  %3122 = vmatpush2.bf16.msra.mxu1 %v4253_v60  ;;  %v4266_v35 = vld [vmem:[#allocation11 + $0x38] sm:$0xff]  }
 0x234   :  { %3123 = vmatprep.subr.bf16.mxu1 %v4258_v5 }
 0x236   :  { %3081 = vmatpush2.bf16.msra.mxu0 %v4208_v37  ;;  %v4268_v37 = vld [vmem:[#allocation11 + $0x30] sm:$0xff]  }
 0x237   :  { %3082 = vmatprep.subr.bf16.mxu0 %v4213_v43  ;;  %3124 = vmatpush2.bf16.msra.mxu1 %v4256_v18  ;;  %v4271_v43 = vld [vmem:[#allocation11 + $0x60] sm:$0xff]  }
 0x238   :  { %3125 = vmatprep.subr.bf16.mxu1 %v4261_v11  ;;  %v4276_v11 = vld [vmem:[#allocation11 + $0x10] sm:$0xff]  }
 0x23a   :  { %3083 = vmatpush2.bf16.msra.mxu0 %v4211_v48  ;;  %v4274_v48 = vld [vmem:[#allocation11 + $0x18] sm:$0xff]  }
 0x23b   :  { %3084 = vmatprep.subr.bf16.mxu0 %v4216_v49  ;;  %3126 = vmatpush2.bf16.msra.mxu1 %v4259_v27  ;;  %v4278_v27 = vld [vmem:[#allocation11 + $0x8] sm:$0xff]  }
 0x23c   :  { %3127 = vmatprep.subr.bf16.mxu1 %v4264_v30  ;;  %v2722_v30 = vld [vmem:[%s4643_s6] sm:$0x3] }
 0x23e   :  { %3085 = vmatpush2.bf16.msra.mxu0 %v4214_v52  ;;  %v1017_v52 = vrot.slane %v4611_v50, %v196_v10 }
 0x23f   :  { %3128 = vmatpush2.bf16.msra.mxu1 %v4262_v16  ;;  %3746 = vmatprep.subr.bf16.mxu0 %v4265_v34  ;;  %v2731_v16 = vrot.slane %v2722_v30, %v4537_v8 }
 0x241   :  { %v2422_v44 = vpop.f32.mrf.mxu0  ;;  %v2465_v59 = vpop.f32.mrf.mxu1 }
 0x242   :  { %v2423_v3 = vadd.f32 %v2422_v44, %v2380_v61 }
 0x243   :  { %v2424_v62 = vpop.f32.mrf.mxu0  ;;  %v2467_v2 = vpop.f32.mrf.mxu1 }
 0x244   :  { %v2425_v1 = vadd.f32 %v2424_v62, %v2382_v25  ;;  %v2466_v23 = vadd.f32 %v2465_v59, %v2423_v3 }
 0x245   :  { %v2426_v4 = vpop.f32.mrf.mxu0  ;;  %v2469_v17 = vpop.f32.mrf.mxu1 }
 0x246   :  { %v2427_v15 = vadd.f32 %v2426_v4, %v2384_v63  ;;  %v2468_v20 = vadd.f32 %v2467_v2, %v2425_v1  ;;  %v2646_v22 = vmax.f32 %v2466_v23, 0.0 }
 0x247   :  { %v2428_v19 = vpop.f32.mrf.mxu0  ;;  %v2471_v24 = vpop.f32.mrf.mxu1 }
 0x248   :  { %v2470_v21 = vadd.f32 %v2469_v17, %v2427_v15  ;;  %v2429_v6 = vadd.f32 %v2428_v19, %v2386_v14  ;;  %v2647_v13 = vmax.f32 %v2468_v20, 0.0 }
 0x24a   :  { %v2472_v26 = vadd.f32 %v2471_v24, %v2429_v6  ;;  %v2650_v28 = vmax.f32 %v2470_v21, 0.0  ;;  %v4275_v24 = vld [vmem:[#allocation11 + $0x50] sm:$0xff]  }
 0x24c   :  { %v2651_v29 = vmax.f32 %v2472_v26, 0.0  ;;  %v2654_v33 = vpack.c.bf16 %v2650_v28, %v2646_v22  ;;  %v4277_v26 = vld [vmem:[#allocation11 + $0x48] sm:$0xff]   ;;  %v4279_v28 = vld [vmem:[#allocation11 + $0x40] sm:$0xff]  }
 0x24e   :  { %v2655_v31 = vpack.c.bf16 %v2651_v29, %v2647_v13  ;;  %v4280_v13 = vld [vmem:[#allocation11] sm:$0xff]  }
 0x250   :  { %3086 = vmatprep.mubr.bf16.mxu0 %v2655_v31 }
 0x251   :  { %3087 = vmatmul.mubr.bf16.vlgmr.msra.gmra.mxu0 %v2654_v33  ;;  %v2727_v33 = vrot.slane %v2722_v30, %v4540_v9 }
 0x252   :  { %3747 = vmatpush3.bf16.msra.mxu0 %v4266_v35 }
 0x253   :  { %3748 = vmatprep.subr.bf16.mxu0 %v4267_v36 }
 0x256   :  { %3749 = vmatpush3.bf16.msra.mxu0 %v4268_v37 }
 0x257   :  { %3750 = vmatprep.subr.bf16.mxu0 %v4269_v38 }
 0x25a   :  { %3751 = vmatpush3.bf16.msra.mxu0 %v4270_v0 }
 0x25b   :  { %3752 = vmatprep.subr.bf16.mxu0 %v4271_v43 }
 0x25e   :  { %3753 = vmatpush3.bf16.msra.mxu0 %v4272_v46 }
 0x25f   :  { %3754 = vmatprep.subr.bf16.mxu0 %v4273_v47 }
 0x262   :  { %3755 = vmatpush3.bf16.msra.mxu0 %v4274_v48 }
 0x263   :  { %3756 = vmatprep.subr.bf16.mxu0 %v4275_v24 }
 0x266   :  { %3757 = vmatpush3.bf16.msra.mxu0 %v4276_v11 }
 0x267   :  { %3758 = vmatprep.subr.bf16.mxu0 %v4277_v26 }
 0x26a   :  { %3759 = vmatpush3.bf16.msra.mxu0 %v4278_v27 }
 0x26b   :  { %3760 = vmatprep.subr.bf16.mxu0 %v4279_v28 }
 0x26e   :  { %3761 = vmatpush3.bf16.msra.mxu0 %v4280_v13 }
 0x281   :  { %v2508_v40 = vpop.f32.mrf.mxu0 }
 0x282   :  { %v2551_v49 = vpop.f32.mrf.mxu1  ;;  %v2509_v55 = vadd.f32 %v2508_v40, %v1013_v53 }
 0x283   :  { %v2510_v42 = vpop.f32.mrf.mxu0 }
 0x284   :  { %v2553_v51 = vpop.f32.mrf.mxu1  ;;  %v2511_v45 = vadd.f32 %v2510_v42, %v1017_v52  ;;  %v2552_v59 = vadd.f32 %v2551_v49, %v2509_v55 }
 0x285   :  { %v2512_v41 = vpop.f32.mrf.mxu0 }
 0x286   :  { %v2555_v54 = vpop.f32.mrf.mxu1  ;;  %v2513_v56 = vadd.f32 %v2512_v41, %v1013_v53  ;;  %v2554_v32 = vadd.f32 %v2553_v51, %v2511_v45  ;;  %v3729_v45 = vld [vmem:[%s4645_s8] ss:$0 sm:$0xff] }
 0x287   :  { %v2514_v39 = vpop.f32.mrf.mxu0 }
 0x288   :  { %v2557_v57 = vpop.f32.mrf.mxu1  ;;  %v2515_v25 = vadd.f32 %v2514_v39, %v1017_v52  ;;  %v2556_v61 = vadd.f32 %v2555_v54, %v2513_v56 }
 0x28a   :  { %v2558_v1 = vadd.f32 %v2557_v57, %v2515_v25 }
 0x2c1   :  { %v2594_v44 = vpop.f32.mrf.mxu0 }
 0x2c2   :  { %v2637_v58 = vpop.f32.mrf.mxu1  ;;  %v2595_v63 = vadd.f32 %v2594_v44, %v2552_v59 }
 0x2c3   :  { %v2596_v60 = vpop.f32.mrf.mxu0 }
 0x2c4   :  { %v2597_v62 = vadd.f32 %v2596_v60, %v2554_v32  ;;  %v2639_v10 = vpop.f32.mrf.mxu1  ;;  %v2638_v14 = vadd.f32 %v2637_v58, %v2595_v63 }
 0x2c5   :  { %v2598_v7 = vpop.f32.mrf.mxu0 }
 0x2c6   :  { %v2599_v12 = vadd.f32 %v2598_v7, %v2556_v61  ;;  %v2641_v50 = vpop.f32.mrf.mxu1  ;;  %v2640_v3 = vadd.f32 %v2639_v10, %v2597_v62  ;;  %v2648_v21 = vmax.f32 %v2638_v14, 0.0 }
 0x2c7   :  { %v2600_v2 = vpop.f32.mrf.mxu0 }
 0x2c8   :  { %v2642_v4 = vadd.f32 %v2641_v50, %v2599_v12  ;;  %v2601_v5 = vadd.f32 %v2600_v2, %v2558_v1  ;;  %v2643_v15 = vpop.f32.mrf.mxu1  ;;  %v2649_v19 = vmax.f32 %v2640_v3, 0.0 }
 0x2ca   :  { %v2644_v17 = vadd.f32 %v2643_v15, %v2601_v5  ;;  %v2652_v18 = vmax.f32 %v2642_v4, 0.0 }
 0x2cc   :  { %v2653_v20 = vmax.f32 %v2644_v17, 0.0  ;;  %v2656_v23 = vpack.c.bf16 %v2652_v18, %v2648_v21 }
 0x2ce   :  { %v2657_v6 = vpack.c.bf16 %v2653_v20, %v2649_v19 }
 0x2d0   :  { %3129 = vmatprep.mubr.bf16.mxu1 %v2657_v6 }
 0x2d1   :  { %3130 = vmatmul.mubr.bf16.vlgmr.msra.gmra.mxu1 %v2656_v23 }
 0x311   :  { %v3088_v29 = vpop.f32.mrf.mxu0 }
 0x312   :  { %v3089_v0 = vadd.f32 %v3088_v29, %v2727_v33 }
 0x313   :  { %v3090_v22 = vpop.f32.mrf.mxu0 }
 0x314   :  { %v3091_v37 = vadd.f32 %v3090_v22, %v2731_v16 }
 0x315   :  { %v3092_v31 = vpop.f32.mrf.mxu0 }
 0x316   :  { %v3093_v38 = vadd.f32 %v3092_v31, %v2727_v33 }
 0x317   :  { %v3094_v35 = vpop.f32.mrf.mxu0 }
 0x318   :  { %v3095_v46 = vadd.f32 %v3094_v35, %v2731_v16 }
 0x391   :  { %v3131_v34 = vpop.f32.mrf.mxu1 }
 0x392   :  { %v3132_v40 = vadd.f32 %v3131_v34, %v3089_v0 }
 0x393   :  { %v3133_v36 = vpop.f32.mrf.mxu1 }
 0x394   :  { %v3134_v47 = vadd.f32 %v3133_v36, %v3091_v37  ;;  %v3140_v41 = vmax.f32 %v3132_v40, 0.0 }
 0x395   :  { %v3135_v43 = vpop.f32.mrf.mxu1 }
 0x396   :  { %v3136_v48 = vadd.f32 %v3135_v43, %v3093_v38  ;;  %v3141_v52 = vmax.f32 %v3134_v47, 0.0 }
 0x397   :  { %v3137_v49 = vpop.f32.mrf.mxu1 }
 0x398   :  { %v3138_v42 = vadd.f32 %v3137_v49, %v3095_v46  ;;  %v3142_v51 = vmax.f32 %v3136_v48, 0.0 }
 0x39a   :  { %v3143_v53 = vmax.f32 %v3138_v42, 0.0  ;;  %v3144_v54 = vpack.c.bf16 %v3142_v51, %v3140_v41 }
 0x39c   :  { %v3145_v8 = vpack.c.bf16 %v3143_v53, %v3141_v52 }
 0x39e   :  { %3313 = vmatprep.mubr.bf16.mxu0 %v3145_v8 }
 0x39f   :  { %3314 = vmatmul.mubr.bf16.vlgmr.msra.gmra.mxu0 %v3144_v54 }
 0x45f   :  { %v3762_v9 = vpop.f32.mrf.mxu0 }
 0x461   :  { %v3763_v55 = vpop.f32.mrf.mxu0 }
 0x462   :  { %v3764_v39 = vadd.f32 %v3763_v55, %v3762_v9 }
 0x463   :  { %v3765_v56 = vpop.f32.mrf.mxu0 }
 0x464   :  { %v3316_v57 = vadd.f32 %v3764_v39, %v3729_v45 }
 0x465   :  { %v3766_v44 = vpop.f32.mrf.mxu0 }
 0x466   :  { %3322 = vst [vmem:[#allocation13] sm:$0xff] %v3316_v57  ;;  %v3767_v32 = vadd.f32 %v3766_v44, %v3765_v56 }
 0x468   :  { %v3319_v25 = vadd.f32 %v3767_v32, %v3729_v45 }
 0x46a   :  { %3323 = vst [vmem:[#allocation13 + $0x8] sm:$0xff] %v3319_v25 }
 0x46b   :  { %4412 = shalt.err (!%p4409_p6)
}
 0x46c   :  { %3335 = dma.vmem_to_hbm [thread:$0]  %s3330_s1, 256, %s4646_s9, [#allocation4], %s4442_s0, %s4442_s0, %s4443_s15  }
 0x46d   :  { %4429 = dma.done.wait [#allocation4], 256  }
 0x46e   :  { %4430 = vsyncadd [#allocation4], 4294967040 }
 0x46f   :  { %3339 = vsyncpa [#allocation3], 1 }
 0x470   :  { %3340 = vsyncpa [#allocation6], 1 }
 0x471   :  { %3341 = vsyncpa [#allocation9], 1 }
 0x472   :  { %3342 = vsyncpa [#allocation12], 1 }
 0x473   :  { %3343 = vsyncpa [#allocation4], 1 }

</bundles_post_ra>
